<compile_context>
chip_gen: v5e
topology: v5e:2x2
jax: 0.10.0
libtpu: 0.0.40
codegen_flags: <defaults>
</compile_context>

<pallas_src>
import functools

import jax
import jax.numpy as jnp
from jax.experimental import pallas as pl
from jax.experimental.pallas import tpu as pltpu

EPS = 1e-5

# bf16 MXU operands (f32 accumulation via preferred_element_type).
MATMUL_DTYPE = jnp.bfloat16


def basicblock_kernel(x_ref, t1_ref, t2_ref, kdn_ref, kup_ref,
                      g1_ref, b1_ref, g2_ref, b2_ref, o_ref, *,
                      inv_count, chans):
    """Whole BasicBlock forward on a lane-dense (N*H, W*C) activation slab.

    x_ref          : (N*H, W*C)   f32  input activations (row-flat NHWC)
    t*_ref         : (3*W*C, W*C) bf16 K-concatenated block-Toeplitz conv weights
    kdn/kup_ref    : (N*H, W*C)   f32  boundary masks for the h-1 / h+1 taps
    g*_ref, b*_ref : (1, W*C)     f32  BN gamma / beta tiled across W
    o_ref          : (N*H, W*C)   f32  output
    """
    f32 = jnp.float32
    x = x_ref[...]
    nh, wc = x.shape
    keep_dn = kdn_ref[...]
    keep_up = kup_ref[...]

    def conv3x3(act, t_ref):
        # H-direction taps via sublane rolls (XLU, overlaps MXU) + boundary
        # masks; W-direction zero padding is encoded in the Toeplitz weights.
        # Single K-concatenated MXU matmul: (NH, 3*WC) x (3*WC, WC), f32 acc.
        a_dn = pltpu.roll(act, shift=1, axis=0) * keep_dn        # row h-1
        a_up = pltpu.roll(act, shift=nh - 1, axis=0) * keep_up   # row h+1
        a_cat = jnp.concatenate([a_dn, act, a_up], axis=1).astype(MATMUL_DTYPE)
        return jnp.dot(a_cat, t_ref[...], preferred_element_type=f32)

    def bn_fold(y, g_ref, b_ref):
        # One-pass batch statistics entirely in f32: reduce rows first
        # (sublane reduction), then fold across W with a log2(W) roll-and-add
        # butterfly so every lane ends up holding its channel total.
        col_sum = jnp.sum(y, axis=0, keepdims=True)        # (1, WC)
        col_sq = jnp.sum(y * y, axis=0, keepdims=True)     # (1, WC)
        s = chans
        while s < wc:                                      # static trip count
            col_sum = col_sum + pltpu.roll(col_sum, shift=s, axis=1)
            col_sq = col_sq + pltpu.roll(col_sq, shift=s, axis=1)
            s *= 2
        mean = col_sum * inv_count
        var = col_sq * inv_count - mean * mean
        scale = g_ref[...] * jax.lax.rsqrt(var + EPS)
        shift = b_ref[...] - mean * scale
        return scale, shift

    y1 = conv3x3(x, t1_ref)
    sc1, sh1 = bn_fold(y1, g1_ref, b1_ref)
    mid = jnp.maximum(y1 * sc1 + sh1, 0.0)

    y2 = conv3x3(mid, t2_ref)
    sc2, sh2 = bn_fold(y2, g2_ref, b2_ref)

    # residual add (downsample=None, stride=1) + final ReLU, lane-dense store
    o_ref[...] = jnp.maximum(y2 * sc2 + sh2 + x, 0.0)


def _row_conv_mats(w_oihw, W):
    """OIHW (Cout, Cin, 3, 3) -> (3*W*Cin, W*Cout) K-concatenated Toeplitz mats.

    Block ky has element [wi*Cin + ci, w*Cout + co] = w[co, ci, ky, kx] for
    wi == w + kx - 1 (taps outside [0, W) are absent == zero padding in W).
    Block order (ky = 0, 1, 2) matches the kernel's [a(h-1) | a(h) | a(h+1)].
    """
    w_hwio = jnp.transpose(w_oihw, (2, 3, 1, 0)).astype(jnp.float32)
    cin, cout = w_hwio.shape[2], w_hwio.shape[3]
    mats = []
    for ky in range(3):
        t = jnp.zeros((W * cin, W * cout), jnp.float32)
        for kx in range(3):
            shift = jnp.eye(W, k=1 - kx, dtype=jnp.float32)  # wi == w + kx - 1
            t = t + jnp.kron(shift, w_hwio[ky, kx])
        mats.append(t)
    return jnp.concatenate(mats, axis=0).astype(MATMUL_DTYPE)


def _row_masks(N, H, WC):
    """(N*H, WC) f32 masks zeroing the h-1 / h+1 taps at image boundaries."""
    rows = jnp.arange(N * H) % H
    keep_dn = jnp.broadcast_to((rows != 0).astype(jnp.float32)[:, None],
                               (N * H, WC))
    keep_up = jnp.broadcast_to((rows != H - 1).astype(jnp.float32)[:, None],
                               (N * H, WC))
    return keep_dn, keep_up


def basic_block_forward(x_nchw, w1_oihw, g1, b1, w2_oihw, g2, b2):
    """Wrapper: NCHW in / NCHW out, parameters in PyTorch conventions."""
    N, C, H, W = x_nchw.shape
    NH, WC = N * H, W * C
    # The in-kernel W-fold butterfly needs W to be a power of two.
    # TODO(synk): fall back to a (1,WC)x(WC,WC) channel-projector dot otherwise.
    assert W & (W - 1) == 0, "W must be a power of two for the BN roll tree"

    # NCHW -> NHWC -> lane-dense (N*H, W*C)
    x_flat = jnp.transpose(x_nchw, (0, 2, 3, 1)).reshape(NH, WC)
    x_flat = x_flat.astype(jnp.float32)

    t1 = _row_conv_mats(w1_oihw, W)
    t2 = _row_conv_mats(w2_oihw, W)
    keep_dn, keep_up = _row_masks(N, H, WC)

    def wide(v):  # per-channel param -> (1, W*C) matching the flat layout
        return jnp.tile(v.reshape(1, C).astype(jnp.float32), (1, W))

    vmem = pl.BlockSpec(memory_space=pltpu.MemorySpace.VMEM)
    out_flat = pl.pallas_call(
        functools.partial(basicblock_kernel,
                          inv_count=1.0 / float(N * H * W), chans=C),
        out_shape=jax.ShapeDtypeStruct((NH, WC), jnp.float32),
        in_specs=[vmem] * 9,
        out_specs=vmem,
    )(x_flat, t1, t2, keep_dn, keep_up,
      wide(g1), wide(b1), wide(g2), wide(b2))

    return jnp.transpose(out_flat.reshape(N, H, W, C), (0, 3, 1, 2))  # -> NCHW


def basic_block_reference(x, w1_oihw, g1, b1, w2_oihw, g2, b2):
    """Plain-JAX f32 reference mirroring the PyTorch forward (training-mode BN)."""
    def conv(v, w):
        return jax.lax.conv_general_dilated(
            v, w, window_strides=(1, 1), padding=((1, 1), (1, 1)),
            dimension_numbers=('NCHW', 'OIHW', 'NCHW'))

    def bn(v, g, b):
        mean = jnp.mean(v, axis=(0, 2, 3), keepdims=True)
        var = jnp.mean((v - mean) ** 2, axis=(0, 2, 3), keepdims=True)
        return ((v - mean) * jax.lax.rsqrt(var + EPS) * g.reshape(1, -1, 1, 1)
                + b.reshape(1, -1, 1, 1))

    out = jnp.maximum(bn(conv(x, w1_oihw), g1, b1), 0.0)
    out = bn(conv(out, w2_oihw), g2, b2)
    return jnp.maximum(out + x, 0.0)


if __name__ == "__main__":
    key = jax.random.PRNGKey(0)
    k_x, k_w1, k_w2, k_g1, k_b1, k_g2, k_b2 = jax.random.split(key, 7)

    N, C, H, W = 2, 16, 16, 16   # inplanes == planes, stride=1, downsample=None

    x = jax.random.normal(k_x, (N, C, H, W), dtype=jnp.float32)
    w1 = 0.1 * jax.random.normal(k_w1, (C, C, 3, 3), dtype=jnp.float32)  # OIHW
    w2 = 0.1 * jax.random.normal(k_w2, (C, C, 3, 3), dtype=jnp.float32)
    g1 = 1.0 + 0.1 * jax.random.normal(k_g1, (C,), dtype=jnp.float32)
    b1 = 0.1 * jax.random.normal(k_b1, (C,), dtype=jnp.float32)
    g2 = 1.0 + 0.1 * jax.random.normal(k_g2, (C,), dtype=jnp.float32)
    b2 = 0.1 * jax.random.normal(k_b2, (C,), dtype=jnp.float32)

    out = basic_block_forward(x, w1, g1, b1, w2, g2, b2)
    out = jax.block_until_ready(out)

    ref = basic_block_reference(x, w1, g1, b1, w2, g2, b2)
    assert out.shape == (N, C, H, W)

    err = jnp.abs(out - ref)
    max_err, mean_err = float(jnp.max(err)), float(jnp.mean(err))
    # bf16 MXU operands => expected quantization error vs. the f32 reference;
    # loose max-error bound plus a tight mean-error bound as structural check.
    assert jnp.allclose(out, ref, atol=1e-1, rtol=1e-1), (max_err, mean_err)
    assert mean_err < 1.5e-2, (max_err, mean_err)

    print("KERNEL_OK")
</pallas_src>

<mosaic_0001>
module attributes {stable_mosaic.version = 11 : i64} {
  func.func @basicblock_kernel(%arg0: memref<32x256xf32, #tpu.memory_space<vmem>>, %arg1: memref<768x256xbf16, #tpu.memory_space<vmem>>, %arg2: memref<768x256xbf16, #tpu.memory_space<vmem>>, %arg3: memref<32x256xf32, #tpu.memory_space<vmem>>, %arg4: memref<32x256xf32, #tpu.memory_space<vmem>>, %arg5: memref<1x256xf32, #tpu.memory_space<vmem>>, %arg6: memref<1x256xf32, #tpu.memory_space<vmem>>, %arg7: memref<1x256xf32, #tpu.memory_space<vmem>>, %arg8: memref<1x256xf32, #tpu.memory_space<vmem>>, %arg9: memref<32x256xf32, #tpu.memory_space<vmem>>) attributes {dimension_semantics = [], scalar_prefetch = 0 : i64, scratch_operands = 0 : i64, tpu.core_type = #tpu.core_type<tc>} {
    %c0 = arith.constant 0 : index
    %c0_0 = arith.constant 0 : index
    %0 = vector.load %arg0[%c0, %c0_0] : memref<32x256xf32, #tpu.memory_space<vmem>>, vector<32x256xf32>
    %c0_1 = arith.constant 0 : index
    %c0_2 = arith.constant 0 : index
    %1 = vector.load %arg3[%c0_1, %c0_2] : memref<32x256xf32, #tpu.memory_space<vmem>>, vector<32x256xf32>
    %c0_3 = arith.constant 0 : index
    %c0_4 = arith.constant 0 : index
    %2 = vector.load %arg4[%c0_3, %c0_4] : memref<32x256xf32, #tpu.memory_space<vmem>>, vector<32x256xf32>
    %c1_i32 = arith.constant 1 : i32
    %3 = tpu.dynamic_rotate %0 by %c1_i32 dim 0 : vector<32x256xf32>, i32 -> vector<32x256xf32>
    %4 = arith.mulf %3, %1 : vector<32x256xf32>
    %c31_i32 = arith.constant 31 : i32
    %5 = tpu.dynamic_rotate %0 by %c31_i32 dim 0 : vector<32x256xf32>, i32 -> vector<32x256xf32>
    %6 = arith.mulf %5, %2 : vector<32x256xf32>
    %7 = tpu.concatenate %4, %0, %6 in 1 : vector<32x256xf32>, vector<32x256xf32>, vector<32x256xf32> -> vector<32x768xf32>
    %8 = arith.truncf %7 : vector<32x768xf32> to vector<32x768xbf16>
    %c0_5 = arith.constant 0 : index
    %c0_6 = arith.constant 0 : index
    %9 = vector.load %arg1[%c0_5, %c0_6] : memref<768x256xbf16, #tpu.memory_space<vmem>>, vector<768x256xbf16>
    %cst = arith.constant dense<0.000000e+00> : vector<32x256xf32>
    %10 = tpu.matmul %8, %9, %cst {dimension_numbers = #tpu.dot_dimension_numbers<[1], [0], [0], [1], [0, 0, 1, 1], [], []>} : vector<32x768xbf16>, vector<768x256xbf16>, vector<32x256xf32> -> vector<32x256xf32>
    %cst_7 = arith.constant dense<0.000000e+00> : vector<256xf32>
    %11 = vector.multi_reduction <add>, %10, %cst_7 [0] : vector<32x256xf32> to vector<256xf32>
    %12 = vector.shape_cast %11 : vector<256xf32> to vector<1x256xf32>
    %13 = arith.mulf %10, %10 : vector<32x256xf32>
    %cst_8 = arith.constant dense<0.000000e+00> : vector<256xf32>
    %14 = vector.multi_reduction <add>, %13, %cst_8 [0] : vector<32x256xf32> to vector<256xf32>
    %15 = vector.shape_cast %14 : vector<256xf32> to vector<1x256xf32>
    %c16_i32 = arith.constant 16 : i32
    %16 = tpu.dynamic_rotate %12 by %c16_i32 dim 1 : vector<1x256xf32>, i32 -> vector<1x256xf32>
    %17 = arith.addf %12, %16 : vector<1x256xf32>
    %c16_i32_9 = arith.constant 16 : i32
    %18 = tpu.dynamic_rotate %15 by %c16_i32_9 dim 1 : vector<1x256xf32>, i32 -> vector<1x256xf32>
    %19 = arith.addf %15, %18 : vector<1x256xf32>
    %c32_i32 = arith.constant 32 : i32
    %20 = tpu.dynamic_rotate %17 by %c32_i32 dim 1 : vector<1x256xf32>, i32 -> vector<1x256xf32>
    %21 = arith.addf %17, %20 : vector<1x256xf32>
    %c32_i32_10 = arith.constant 32 : i32
    %22 = tpu.dynamic_rotate %19 by %c32_i32_10 dim 1 : vector<1x256xf32>, i32 -> vector<1x256xf32>
    %23 = arith.addf %19, %22 : vector<1x256xf32>
    %c64_i32 = arith.constant 64 : i32
    %24 = tpu.dynamic_rotate %21 by %c64_i32 dim 1 : vector<1x256xf32>, i32 -> vector<1x256xf32>
    %25 = arith.addf %21, %24 : vector<1x256xf32>
    %c64_i32_11 = arith.constant 64 : i32
    %26 = tpu.dynamic_rotate %23 by %c64_i32_11 dim 1 : vector<1x256xf32>, i32 -> vector<1x256xf32>
    %27 = arith.addf %23, %26 : vector<1x256xf32>
    %c128_i32 = arith.constant 128 : i32
    %28 = tpu.dynamic_rotate %25 by %c128_i32 dim 1 : vector<1x256xf32>, i32 -> vector<1x256xf32>
    %29 = arith.addf %25, %28 : vector<1x256xf32>
    %c128_i32_12 = arith.constant 128 : i32
    %30 = tpu.dynamic_rotate %27 by %c128_i32_12 dim 1 : vector<1x256xf32>, i32 -> vector<1x256xf32>
    %31 = arith.addf %27, %30 : vector<1x256xf32>
    %cst_13 = arith.constant 0.001953125 : f32
    %32 = vector.broadcast %cst_13 : f32 to vector<1x256xf32>
    %33 = arith.mulf %29, %32 : vector<1x256xf32>
    %cst_14 = arith.constant 0.001953125 : f32
    %34 = vector.broadcast %cst_14 : f32 to vector<1x256xf32>
    %35 = arith.mulf %31, %34 : vector<1x256xf32>
    %36 = arith.mulf %33, %33 : vector<1x256xf32>
    %37 = arith.subf %35, %36 : vector<1x256xf32>
    %c0_15 = arith.constant 0 : index
    %c0_16 = arith.constant 0 : index
    %38 = vector.load %arg5[%c0_15, %c0_16] : memref<1x256xf32, #tpu.memory_space<vmem>>, vector<1x256xf32>
    %cst_17 = arith.constant 9.99999974E-6 : f32
    %39 = vector.broadcast %cst_17 : f32 to vector<1x256xf32>
    %40 = arith.addf %37, %39 : vector<1x256xf32>
    %41 = math.rsqrt %40 : vector<1x256xf32>
    %42 = arith.mulf %38, %41 : vector<1x256xf32>
    %c0_18 = arith.constant 0 : index
    %c0_19 = arith.constant 0 : index
    %43 = vector.load %arg6[%c0_18, %c0_19] : memref<1x256xf32, #tpu.memory_space<vmem>>, vector<1x256xf32>
    %44 = arith.mulf %33, %42 : vector<1x256xf32>
    %45 = arith.subf %43, %44 : vector<1x256xf32>
    %46 = vector.broadcast %42 : vector<1x256xf32> to vector<32x256xf32>
    %47 = arith.mulf %10, %46 : vector<32x256xf32>
    %48 = vector.broadcast %45 : vector<1x256xf32> to vector<32x256xf32>
    %49 = arith.addf %47, %48 : vector<32x256xf32>
    %cst_20 = arith.constant 0.000000e+00 : f32
    %50 = vector.broadcast %cst_20 : f32 to vector<32x256xf32>
    %51 = arith.maximumf %49, %50 : vector<32x256xf32>
    %c1_i32_21 = arith.constant 1 : i32
    %52 = tpu.dynamic_rotate %51 by %c1_i32_21 dim 0 : vector<32x256xf32>, i32 -> vector<32x256xf32>
    %53 = arith.mulf %52, %1 : vector<32x256xf32>
    %c31_i32_22 = arith.constant 31 : i32
    %54 = tpu.dynamic_rotate %51 by %c31_i32_22 dim 0 : vector<32x256xf32>, i32 -> vector<32x256xf32>
    %55 = arith.mulf %54, %2 : vector<32x256xf32>
    %56 = tpu.concatenate %53, %51, %55 in 1 : vector<32x256xf32>, vector<32x256xf32>, vector<32x256xf32> -> vector<32x768xf32>
    %57 = arith.truncf %56 : vector<32x768xf32> to vector<32x768xbf16>
    %c0_23 = arith.constant 0 : index
    %c0_24 = arith.constant 0 : index
    %58 = vector.load %arg2[%c0_23, %c0_24] : memref<768x256xbf16, #tpu.memory_space<vmem>>, vector<768x256xbf16>
    %cst_25 = arith.constant dense<0.000000e+00> : vector<32x256xf32>
    %59 = tpu.matmul %57, %58, %cst_25 {dimension_numbers = #tpu.dot_dimension_numbers<[1], [0], [0], [1], [0, 0, 1, 1], [], []>} : vector<32x768xbf16>, vector<768x256xbf16>, vector<32x256xf32> -> vector<32x256xf32>
    %cst_26 = arith.constant dense<0.000000e+00> : vector<256xf32>
    %60 = vector.multi_reduction <add>, %59, %cst_26 [0] : vector<32x256xf32> to vector<256xf32>
    %61 = vector.shape_cast %60 : vector<256xf32> to vector<1x256xf32>
    %62 = arith.mulf %59, %59 : vector<32x256xf32>
    %cst_27 = arith.constant dense<0.000000e+00> : vector<256xf32>
    %63 = vector.multi_reduction <add>, %62, %cst_27 [0] : vector<32x256xf32> to vector<256xf32>
    %64 = vector.shape_cast %63 : vector<256xf32> to vector<1x256xf32>
    %c16_i32_28 = arith.constant 16 : i32
    %65 = tpu.dynamic_rotate %61 by %c16_i32_28 dim 1 : vector<1x256xf32>, i32 -> vector<1x256xf32>
    %66 = arith.addf %61, %65 : vector<1x256xf32>
    %c16_i32_29 = arith.constant 16 : i32
    %67 = tpu.dynamic_rotate %64 by %c16_i32_29 dim 1 : vector<1x256xf32>, i32 -> vector<1x256xf32>
    %68 = arith.addf %64, %67 : vector<1x256xf32>
    %c32_i32_30 = arith.constant 32 : i32
    %69 = tpu.dynamic_rotate %66 by %c32_i32_30 dim 1 : vector<1x256xf32>, i32 -> vector<1x256xf32>
    %70 = arith.addf %66, %69 : vector<1x256xf32>
    %c32_i32_31 = arith.constant 32 : i32
    %71 = tpu.dynamic_rotate %68 by %c32_i32_31 dim 1 : vector<1x256xf32>, i32 -> vector<1x256xf32>
    %72 = arith.addf %68, %71 : vector<1x256xf32>
    %c64_i32_32 = arith.constant 64 : i32
    %73 = tpu.dynamic_rotate %70 by %c64_i32_32 dim 1 : vector<1x256xf32>, i32 -> vector<1x256xf32>
    %74 = arith.addf %70, %73 : vector<1x256xf32>
    %c64_i32_33 = arith.constant 64 : i32
    %75 = tpu.dynamic_rotate %72 by %c64_i32_33 dim 1 : vector<1x256xf32>, i32 -> vector<1x256xf32>
    %76 = arith.addf %72, %75 : vector<1x256xf32>
    %c128_i32_34 = arith.constant 128 : i32
    %77 = tpu.dynamic_rotate %74 by %c128_i32_34 dim 1 : vector<1x256xf32>, i32 -> vector<1x256xf32>
    %78 = arith.addf %74, %77 : vector<1x256xf32>
    %c128_i32_35 = arith.constant 128 : i32
    %79 = tpu.dynamic_rotate %76 by %c128_i32_35 dim 1 : vector<1x256xf32>, i32 -> vector<1x256xf32>
    %80 = arith.addf %76, %79 : vector<1x256xf32>
    %cst_36 = arith.constant 0.001953125 : f32
    %81 = vector.broadcast %cst_36 : f32 to vector<1x256xf32>
    %82 = arith.mulf %78, %81 : vector<1x256xf32>
    %cst_37 = arith.constant 0.001953125 : f32
    %83 = vector.broadcast %cst_37 : f32 to vector<1x256xf32>
    %84 = arith.mulf %80, %83 : vector<1x256xf32>
    %85 = arith.mulf %82, %82 : vector<1x256xf32>
    %86 = arith.subf %84, %85 : vector<1x256xf32>
    %c0_38 = arith.constant 0 : index
    %c0_39 = arith.constant 0 : index
    %87 = vector.load %arg7[%c0_38, %c0_39] : memref<1x256xf32, #tpu.memory_space<vmem>>, vector<1x256xf32>
    %cst_40 = arith.constant 9.99999974E-6 : f32
    %88 = vector.broadcast %cst_40 : f32 to vector<1x256xf32>
    %89 = arith.addf %86, %88 : vector<1x256xf32>
    %90 = math.rsqrt %89 : vector<1x256xf32>
    %91 = arith.mulf %87, %90 : vector<1x256xf32>
    %c0_41 = arith.constant 0 : index
    %c0_42 = arith.constant 0 : index
    %92 = vector.load %arg8[%c0_41, %c0_42] : memref<1x256xf32, #tpu.memory_space<vmem>>, vector<1x256xf32>
    %93 = arith.mulf %82, %91 : vector<1x256xf32>
    %94 = arith.subf %92, %93 : vector<1x256xf32>
    %95 = vector.broadcast %91 : vector<1x256xf32> to vector<32x256xf32>
    %96 = arith.mulf %59, %95 : vector<32x256xf32>
    %97 = vector.broadcast %94 : vector<1x256xf32> to vector<32x256xf32>
    %98 = arith.addf %96, %97 : vector<32x256xf32>
    %99 = arith.addf %98, %0 : vector<32x256xf32>
    %cst_43 = arith.constant 0.000000e+00 : f32
    %100 = vector.broadcast %cst_43 : f32 to vector<32x256xf32>
    %101 = arith.maximumf %99, %100 : vector<32x256xf32>
    %c0_44 = arith.constant 0 : index
    %c0_45 = arith.constant 0 : index
    %102 = vector.load %arg9[%c0_44, %c0_45] : memref<32x256xf32, #tpu.memory_space<vmem>>, vector<32x256xf32>
    tpu.vector_store %arg9[%c0_44, %c0_45], %101 {strides = array<i32>} : memref<32x256xf32, #tpu.memory_space<vmem>>, vector<32x256xf32>,
    return
  }
}

</mosaic_0001>

<bundles_post_ra>
// kernel: tpu_custom_call.1
= control target key start
LH: loop header
LB: loop body
LE: loop exit
PB: predicated region body
PF: predicated region fallthrough
CT: control target
= control target key end

     0   :  { %14 = vsyncpa [#allocation3], 0  ;;  %s4029_s0 = inlined_call_operand.hbm [shape: f32[32,256], index: 0, kind: input, shape index: {}]   ;;  %s4030_s1 = inlined_call_operand.hbm [shape: bf16[768,256], index: 1, kind: input, shape index: {}]   ;;  %s4031_s2 = inlined_call_operand.hbm [shape: bf16[768,256], index: 2, kind: input, shape index: {}]   ;;  %s4032_s3 = inlined_call_operand.hbm [shape: f32[32,256], index: 3, kind: input, shape index: {}]   ;;  %s4033_s4 = inlined_call_operand.hbm [shape: f32[32,256], index: 4, kind: input, shape index: {}]   ;;  %s4034_s5 = inlined_call_operand.vmem [shape: f32[1,256], index: 5, kind: input, shape index: {}]   ;;  %s4035_s6 = inlined_call_operand.vmem [shape: f32[1,256], index: 6, kind: input, shape index: {}]   ;;  %s4036_s7 = inlined_call_operand.vmem [shape: f32[1,256], index: 7, kind: input, shape index: {}]   ;;  %s4037_s8 = inlined_call_operand.hbm [shape: f32[1,256], index: 8, kind: input, shape index: {}]   ;;  %s4038_s9 = inlined_call_operand.hbm [shape: f32[32,256], index: 9, kind: output, shape index: {}]  }
   0x1   :  { %15 = vsyncpa [#allocation6], 0 }
   0x2   :  { %16 = vsyncpa [#allocation9], 0 }
   0x3   :  { %17 = vsyncpa [#allocation12], 0  ;;  %s36_s11 = sshll.u32 %s4030_s1, 4  ;;  %s37_s11 = int_to_ptr.hbm [resolvable:$true] %s36_s11 }
   0x4   :  { %18 = vsyncpa [#allocation4], 0  ;;  %s3420_s12 = smov [#allocation5]   ;;  %s3421_s14 = smov 128  }
   0x5   :  { %s38_s13 = sshll.u32 %s3420_s12, 4  ;;  %s3422_s15 = smov 8   ;;  %s39_s13 = int_to_ptr.vmem [resolvable:$true] %s38_s13 }
   0x6   :  { %44 = dma.hbm_to_vmem [thread:$0]  %s37_s11, 12288, %s39_s13, [#allocation6], %s3421_s14, %s3421_s14, %s3422_s15  }
   0x7   :  { %s62_s18 = sshll.u32 %s4032_s3, 4  ;;  %s3423_s19 = smov [#allocation8]   ;;  %s63_s18 = int_to_ptr.hbm [resolvable:$true] %s62_s18 }
   0x8   :  { %s64_s20 = sshll.u32 %s3423_s19, 4  ;;  %s23_s23 = sshll.u32 %s4029_s0, 4  ;;  %s65_s20 = int_to_ptr.vmem [resolvable:$true] %s64_s20  ;;  %s24_s23 = int_to_ptr.hbm [resolvable:$true] %s23_s23 }
   0x9   :  { %s3424_s1 = smov 256   ;;  %s3425_s24 = smov 16  }
   0xa   :  { %70 = dma.hbm_to_vmem [thread:$0]  %s63_s18, 1024, %s65_s20, [#allocation9], %s3424_s1, %s3424_s1, %s3425_s24  }
   0xb   :  { %s49_s27 = sshll.u32 %s4031_s2, 4  ;;  %s3426_s3 = smov [#allocation2]   ;;  %s50_s27 = int_to_ptr.hbm [resolvable:$true] %s49_s27 }
   0xc   :  { %s25_s28 = sshll.u32 %s3426_s3, 4  ;;  %s3427_s0 = smov [#allocation7]   ;;  %s26_s28 = int_to_ptr.vmem [resolvable:$true] %s25_s28 }
   0xd   :  { %31 = dma.hbm_to_vmem [thread:$0]  %s24_s23, 1024, %s26_s28, [#allocation3], %s3424_s1, %s3424_s1, %s3425_s24  }
   0xe   :  { %s51_s29 = sshll.u32 %s3427_s0, 4  ;;  %s75_s11 = sshll.u32 %s4033_s4, 4  ;;  %s52_s29 = int_to_ptr.vmem [resolvable:$true] %s51_s29  ;;  %s76_s11 = int_to_ptr.hbm [resolvable:$true] %s75_s11 }
   0xf   :  { %57 = dma.hbm_to_vmem [thread:$0]  %s50_s27, 12288, %s52_s29, [#allocation6], %s3421_s14, %s3421_s14, %s3422_s15  }
  0x10   :  { %s95_s2 = sshll.u32 %s4037_s8, 4  ;;  %s3428_s16 = smov [#allocation10]   ;;  %s96_s2 = int_to_ptr.hbm [resolvable:$true] %s95_s2 }
  0x11   :  { %s77_s17 = sshll.u32 %s3428_s16, 4  ;;  %s3429_s18 = smov [#allocation11]   ;;  %s78_s17 = int_to_ptr.vmem [resolvable:$true] %s77_s17 }
  0x12   :  { %83 = dma.hbm_to_vmem [thread:$0]  %s76_s11, 1024, %s78_s17, [#allocation9], %s3424_s1, %s3424_s1, %s3425_s24  }
  0x13   :  { %s97_s19 = sshll.u32 %s3429_s18, 4  ;;  %s98_s19 = int_to_ptr.vmem [resolvable:$true] %s97_s19 }
  0x14   :  { %100 = dma.hbm_to_vmem [thread:$0]  %s96_s2, 32, %s98_s19, [#allocation12]  }
  0x15   :  { %3410 = dma.done.wait [#allocation3], 1024  }
  0x16   :  { %3411 = vsyncadd [#allocation3], 4294966272 }
  0x17   :  { %3412 = dma.done.wait [#allocation6], 24576  }
  0x18   :  { %3413 = vsyncadd [#allocation6], 4294942720 }
  0x19   :  { %3414 = dma.done.wait [#allocation9], 2048  }
  0x1a   :  { %3415 = vsyncadd [#allocation9], 4294965248 }
  0x1b   :  { %3416 = dma.done.wait [#allocation12], 32  }
  0x1c   :  { %3417 = vsyncadd [#allocation12], 4294967264  ;;  %v2299_v0 = vld [vmem:[#allocation5 + $0x70] sm:$0xf]  ;;  %v3024_v1 = vld [vmem:[#allocation5 + $0x74] sm:$0xf0]  ;;  %v157_v45 = vlaneseq }
  0x1d   :  { %v2363_v2 = vld [vmem:[#allocation5 + $0xf0] sm:$0xf]  ;;  %v2300_v3 = vor.u32 %v3024_v1, %v2299_v0  ;;  %v3040_v4 = vld [vmem:[#allocation5 + $0xf4] sm:$0xf0]  ;;  %v2291_v11 = vld [vmem:[#allocation5 + $0x60] sm:$0xf] }
  0x1e   :  { %v2427_v5 = vld [vmem:[#allocation5 + $0x170] sm:$0xf]  ;;  %v3056_v6 = vld [vmem:[#allocation5 + $0x174] sm:$0xf0]  ;;  %v2364_v7 = vor.u32 %v3040_v4, %v2363_v2  ;;  %v3022_v13 = vld [vmem:[#allocation5 + $0x64] sm:$0xf0] }
  0x1f   :  { %v2428_v8 = vor.u32 %v3056_v6, %v2427_v5  ;;  %v2491_v9 = vld [vmem:[#allocation5 + $0x1f0] sm:$0xf]  ;;  %v3072_v10 = vld [vmem:[#allocation5 + $0x1f4] sm:$0xf0]  ;;  %789 = vmatpush.bf16.msra.mxu0 %v2300_v3  ;;  %v2355_v14 = vld [vmem:[#allocation5 + $0xe0] sm:$0xf]  ;;  %v2292_v16 = vor.u32 %v3022_v13, %v2291_v11 }
  0x20   :  { %v2492_v12 = vor.u32 %v3072_v10, %v2491_v9  ;;  %v3038_v15 = vld [vmem:[#allocation5 + $0xe4] sm:$0xf0]  ;;  %808 = vmatpush.bf16.msra.mxu1 %v2364_v7  ;;  %v2419_v18 = vld [vmem:[#allocation5 + $0x160] sm:$0xf]  ;;  %v2283_v23 = vld [vmem:[#allocation5 + $0x50] sm:$0xf] }
  0x21   :  { %827 = vmatpush.bf16.msra.mxu2 %v2428_v8  ;;  %v2356_v17 = vor.u32 %v3038_v15, %v2355_v14  ;;  %v3054_v19 = vld [vmem:[#allocation5 + $0x164] sm:$0xf0]  ;;  %v2483_v20 = vld [vmem:[#allocation5 + $0x1e0] sm:$0xf]  ;;  %v3020_v24 = vld [vmem:[#allocation5 + $0x54] sm:$0xf0] }
  0x22   :  { %846 = vmatpush.bf16.msra.mxu3 %v2492_v12  ;;  %v2420_v21 = vor.u32 %v3054_v19, %v2419_v18  ;;  %v3070_v22 = vld [vmem:[#allocation5 + $0x1e4] sm:$0xf0]  ;;  %v2347_v26 = vld [vmem:[#allocation5 + $0xd0] sm:$0xf]  ;;  %v3036_v27 = vld [vmem:[#allocation5 + $0xd4] sm:$0xf0]  ;;  %v2284_v29 = vor.u32 %v3020_v24, %v2283_v23 }
  0x23   :  { %v2484_v25 = vor.u32 %v3070_v22, %v2483_v20  ;;  %v2411_v28 = vld [vmem:[#allocation5 + $0x150] sm:$0xf]  ;;  %790 = vmatpush.bf16.msra.mxu0 %v2292_v16  ;;  %v3052_v30 = vld [vmem:[#allocation5 + $0x154] sm:$0xf0]  ;;  %v2348_v33 = vor.u32 %v3036_v27, %v2347_v26  ;;  %v2275_v35 = vld [vmem:[#allocation5 + $0x40] sm:$0xf] }
  0x24   :  { %v2475_v31 = vld [vmem:[#allocation5 + $0x1d0] sm:$0xf]  ;;  %v3068_v32 = vld [vmem:[#allocation5 + $0x1d4] sm:$0xf0]  ;;  %809 = vmatpush.bf16.msra.mxu1 %v2356_v17  ;;  %v2412_v34 = vor.u32 %v3052_v30, %v2411_v28  ;;  %v3018_v36 = vld [vmem:[#allocation5 + $0x44] sm:$0xf0] }
  0x25   :  { %828 = vmatpush.bf16.msra.mxu2 %v2420_v21  ;;  %v2339_v37 = vld [vmem:[#allocation5 + $0xc0] sm:$0xf]  ;;  %v2476_v38 = vor.u32 %v3068_v32, %v2475_v31  ;;  %v3034_v39 = vld [vmem:[#allocation5 + $0xc4] sm:$0xf0]  ;;  %v2276_v44 = vor.u32 %v3018_v36, %v2275_v35  ;;  %v2267_v48 = vld [vmem:[#allocation5 + $0x30] sm:$0xf] }
  0x26   :  { %847 = vmatpush.bf16.msra.mxu3 %v2484_v25  ;;  %v2403_v40 = vld [vmem:[#allocation5 + $0x140] sm:$0xf]  ;;  %v3050_v41 = vld [vmem:[#allocation5 + $0x144] sm:$0xf0]  ;;  %v2340_v46 = vor.u32 %v3034_v39, %v2339_v37  ;;  %v3016_v49 = vld [vmem:[#allocation5 + $0x34] sm:$0xf0] }
  0x27   :  { %v2467_v42 = vld [vmem:[#allocation5 + $0x1c0] sm:$0xf]  ;;  %v3066_v43 = vld [vmem:[#allocation5 + $0x1c4] sm:$0xf0]  ;;  %791 = vmatpush.bf16.msra.mxu0 %v2284_v29  ;;  %v2404_v47 = vor.u32 %v3050_v41, %v2403_v40  ;;  %v2331_v50 = vld [vmem:[#allocation5 + $0xb0] sm:$0xf]  ;;  %v2268_v57 = vor.u32 %v3016_v49, %v2267_v48 }
  0x28   :  { %810 = vmatpush.bf16.msra.mxu1 %v2348_v33  ;;  %v2468_v51 = vor.u32 %v3066_v43, %v2467_v42  ;;  %v3032_v52 = vld [vmem:[#allocation5 + $0xb4] sm:$0xf0]  ;;  %v2395_v53 = vld [vmem:[#allocation5 + $0x130] sm:$0xf]  ;;  %v3511_v58 = vshrl.u32 %v157_v45, 7  ;;  %v3513_v18 = vld [vmem:[#allocation2] sm:$0xff] }
  0x29   :  { %829 = vmatpush.bf16.msra.mxu2 %v2412_v34  ;;  %v3048_v54 = vld [vmem:[#allocation5 + $0x134] sm:$0xf0]  ;;  %v2459_v55 = vld [vmem:[#allocation5 + $0x1b0] sm:$0xf]  ;;  %v2332_v59 = vor.u32 %v3032_v52, %v2331_v50  ;;  %v2259_v61 = vld [vmem:[#allocation5 + $0x20] sm:$0xf] }
  0x2a   :  { %848 = vmatpush.bf16.msra.mxu3 %v2476_v38  ;;  %v3064_v56 = vld [vmem:[#allocation5 + $0x1b4] sm:$0xf0]  ;;  %v2396_v60 = vor.u32 %v3048_v54, %v2395_v53  ;;  %v3014_v62 = vld [vmem:[#allocation5 + $0x24] sm:$0xf0]  ;;  %v2323_v63 = vld [vmem:[#allocation5 + $0xa0] sm:$0xf] }
  0x2b   :  { %792 = vmatpush.bf16.msra.mxu0 %v2276_v44  ;;  %v2460_v0 = vor.u32 %v3064_v56, %v2459_v55  ;;  %v3030_v1 = vld [vmem:[#allocation5 + $0xa4] sm:$0xf0]  ;;  %v2387_v2 = vld [vmem:[#allocation5 + $0x120] sm:$0xf]  ;;  %v2251_v6 = vld [vmem:[#allocation5 + $0x10] sm:$0xf]  ;;  %v2260_v7 = vor.u32 %v3014_v62, %v2259_v61 }
  0x2c   :  { %811 = vmatpush.bf16.msra.mxu1 %v2340_v46  ;;  %v3046_v3 = vld [vmem:[#allocation5 + $0x124] sm:$0xf0]  ;;  %v2451_v4 = vld [vmem:[#allocation5 + $0x1a0] sm:$0xf]  ;;  %v3012_v8 = vld [vmem:[#allocation5 + $0x14] sm:$0xf0]  ;;  %v2324_v11 = vor.u32 %v3030_v1, %v2323_v63 }
  0x2d   :  { %830 = vmatpush.bf16.msra.mxu2 %v2404_v47  ;;  %v3062_v5 = vld [vmem:[#allocation5 + $0x1a4] sm:$0xf0]  ;;  %v2315_v9 = vld [vmem:[#allocation5 + $0x90] sm:$0xf]  ;;  %v3028_v10 = vld [vmem:[#allocation5 + $0x94] sm:$0xf0]  ;;  %v2388_v12 = vor.u32 %v3046_v3, %v2387_v2  ;;  %v2252_v27 = vor.u32 %v3012_v8, %v2251_v6 }
  0x2e   :  { %849 = vmatpush.bf16.msra.mxu3 %v2468_v51  ;;  %v2379_v13 = vld [vmem:[#allocation5 + $0x110] sm:$0xf]  ;;  %v3044_v14 = vld [vmem:[#allocation5 + $0x114] sm:$0xf0]  ;;  %v2452_v16 = vor.u32 %v3062_v5, %v2451_v4  ;;  %vm159_vm0 = vcmp.lt.s32.totalorder %v3511_v58, 1  ;;  %v133_v23 = vld [vmem:[#allocation8] sm:$0xff]  ;;  %v2316_v28 = vor.u32 %v3028_v10, %v2315_v9 }
  0x2f   :  { %793 = vmatpush.bf16.msra.mxu0 %v2268_v57  ;;  %v2443_v15 = vld [vmem:[#allocation5 + $0x190] sm:$0xf]  ;;  %v3060_v17 = vld [vmem:[#allocation5 + $0x194] sm:$0xf0]  ;;  %v2243_v20 = vld [vmem:[#allocation5] sm:$0xf]  ;;  %v2380_v29 = vor.u32 %v3044_v14, %v2379_v13 }
  0x30   :  { %812 = vmatpush.bf16.msra.mxu1 %v2332_v59  ;;  %v3515_v19 = vld [vmem:[#allocation2 + $0x10] sm:$0xff]  ;;  %v3010_v21 = vld [vmem:[#allocation5 + $0x4] sm:$0xf0]  ;;  %v149_v25 = vrot.slane %v3513_v18, 7  ;;  %v2307_v30 = vld [vmem:[#allocation5 + $0x80] sm:$0xf]  ;;  %v2444_v42 = vor.u32 %v3060_v17, %v2443_v15 }
  0x31   :  { %831 = vmatpush.bf16.msra.mxu2 %v2396_v60  ;;  %v3518_v22 = vld [vmem:[#allocation2 + $0x30] sm:$0xff]  ;;  %v151_v26 = vrot.slane %v3515_v19, 7  ;;  %v3026_v31 = vld [vmem:[#allocation5 + $0x84] sm:$0xf0]  ;;  %v3525_v34 = vld [vmem:[#allocation2 + $0x18] sm:$0xff]  ;;  %v2244_v55 = vor.u32 %v3010_v21, %v2243_v20  ;;  %v3554_v10 = vpack.c.bf16 %v3515_v19, %v3513_v18  ;;  %vm184_vm1 = vcmp.lt.s32.totalorder %v3511_v58, 7 }
  0x32   :  { %850 = vmatpush.bf16.msra.mxu3 %v2460_v0  ;;  %v135_v24 = vld [vmem:[#allocation8 + $0x10] sm:$0xff]  ;;  %v155_v32 = vrot.slane %v3518_v22, 7  ;;  %v3523_v33 = vld [vmem:[#allocation2 + $0x8] sm:$0xff]  ;;  %v3527_v35 = vld [vmem:[#allocation2 + $0x38] sm:$0xff]  ;;  %v152_v40 = vrot.slane %v3525_v34, 7  ;;  %v2308_v61 = vor.u32 %v3026_v31, %v2307_v30  ;;  %s3430_s4 = smov 32  }
  0x33   :  { %794 = vmatpush.bf16.msra.mxu0 %v2260_v7  ;;  %v164_v36 = vsel %vm159_vm0, %v149_v25, %v151_v26  ;;  %v134_v37 = vld [vmem:[#allocation8 + $0x8] sm:$0xff]  ;;  %v136_v38 = vld [vmem:[#allocation8 + $0x18] sm:$0xff]  ;;  %v150_v39 = vrot.slane %v3523_v33, 7  ;;  %v156_v41 = vrot.slane %v3527_v35, 7  ;;  %v2371_v43 = vld [vmem:[#allocation5 + $0x100] sm:$0xf]  ;;  %v3558_v13 = vpack.c.bf16 %v3525_v34, %v3523_v33 }
  0x34   :  { %813 = vmatpush.bf16.msra.mxu1 %v2324_v11  ;;  %v3042_v44 = vld [vmem:[#allocation5 + $0x104] sm:$0xf0]  ;;  %v2435_v46 = vld [vmem:[#allocation5 + $0x180] sm:$0xf]  ;;  %v166_v47 = vsel %vm159_vm0, %v155_v32, %v149_v25  ;;  %v170_v50 = vmul.f32 %v164_v36, %v135_v24  ;;  %v3023_v53 = vld [vmem:[#allocation5 + $0x74] sm:$0xf] }
  0x35   :  { %832 = vmatpush.bf16.msra.mxu2 %v2388_v12  ;;  %v3058_v48 = vld [vmem:[#allocation5 + $0x184] sm:$0xf0]  ;;  %v168_v49 = vmul.f32 %v166_v47, %v133_v23  ;;  %v165_v51 = vsel %vm159_vm0, %v150_v39, %v152_v40  ;;  %v167_v52 = vsel %vm159_vm0, %v156_v41, %v150_v39  ;;  %v2301_v54 = vld [vmem:[#allocation5 + $0x78] sm:$0xf0]  ;;  %v2619_v59 = vld [vmem:[#allocation5 + $0x2f0] sm:$0xf]  ;;  %v2372_v62 = vor.u32 %v3042_v44, %v2371_v43 }
  0x36   :  { %851 = vmatpush.bf16.msra.mxu3 %v2452_v16  ;;  %v169_v56 = vmul.f32 %v167_v52, %v134_v37  ;;  %v171_v57 = vmul.f32 %v165_v51, %v136_v38  ;;  %v3104_v60 = vld [vmem:[#allocation5 + $0x2f4] sm:$0xf0]  ;;  %v2436_v63 = vor.u32 %v3058_v48, %v2435_v46  ;;  %v2304_v0 = vor.u32 %v3023_v53, %v2301_v54  ;;  %v2555_v1 = vld [vmem:[#allocation5 + $0x270] sm:$0xf]  ;;  %v3039_v3 = vld [vmem:[#allocation5 + $0xf4] sm:$0xf] }
  0x37   :  { %795 = vmatpush.bf16.msra.mxu0 %v2252_v27  ;;  %v3088_v2 = vld [vmem:[#allocation5 + $0x274] sm:$0xf0]  ;;  %v3548_v4 = vpack.c.bf16 %v170_v50, %v168_v49  ;;  %v2620_v5 = vor.u32 %v3104_v60, %v2619_v59  ;;  %v2365_v6 = vld [vmem:[#allocation5 + $0xf8] sm:$0xf0]  ;;  %v3021_v7 = vld [vmem:[#allocation5 + $0x64] sm:$0xf] }
  0x38   :  { %814 = vmatpush.bf16.msra.mxu1 %v2316_v28  ;;  %v2293_v8 = vld [vmem:[#allocation5 + $0x68] sm:$0xf0]  ;;  %v3550_v9 = vpack.c.bf16 %v171_v57, %v169_v56  ;;  %v2611_v11 = vld [vmem:[#allocation5 + $0x2e0] sm:$0xf]  ;;  %v3102_v12 = vld [vmem:[#allocation5 + $0x2e4] sm:$0xf0]  ;;  %v2556_v14 = vor.u32 %v3088_v2, %v2555_v1  ;;  %v2368_v16 = vor.u32 %v3039_v3, %v2365_v6 }
  0x39   :  { %833 = vmatpush.bf16.msra.mxu2 %v2380_v29  ;;  %v3560_v15 = vld [vmem:[#allocation2 + $0x20] sm:$0xff]  ;;  %v2296_v17 = vor.u32 %v3021_v7, %v2293_v8  ;;  %v3086_v21 = vld [vmem:[#allocation5 + $0x264] sm:$0xf0]  ;;  %v2612_v24 = vor.u32 %v3102_v12, %v2611_v11  ;;  %v2357_v25 = vld [vmem:[#allocation5 + $0xe8] sm:$0xf0]  ;;  %s3431_s8 = smov 64  }
  0x3a   :  { %852 = vmatpush.bf16.msra.mxu3 %v2444_v42  ;;  %v2547_v20 = vld [vmem:[#allocation5 + $0x260] sm:$0xf]  ;;  %v3037_v23 = vld [vmem:[#allocation5 + $0xe4] sm:$0xf]  ;;  %v3019_v27 = vld [vmem:[#allocation5 + $0x54] sm:$0xf] }
  0x3b   :  { %796 = vmatpush.bf16.msra.mxu0 %v2244_v55  ;;  %v2285_v28 = vld [vmem:[#allocation5 + $0x58] sm:$0xf0]  ;;  %v2603_v29 = vld [vmem:[#allocation5 + $0x2d0] sm:$0xf]  ;;  %v3100_v30 = vld [vmem:[#allocation5 + $0x2d4] sm:$0xf0]  ;;  %v2548_v36 = vor.u32 %v3086_v21, %v2547_v20  ;;  %v2360_v42 = vor.u32 %v3037_v23, %v2357_v25 }
  0x3c   :  { %815 = vmatpush.bf16.msra.mxu1 %v2308_v61  ;;  %v153_v31 = vrot.slane %v3560_v15, 7  ;;  %v2539_v37 = vld [vmem:[#allocation5 + $0x250] sm:$0xf]  ;;  %v3084_v38 = vld [vmem:[#allocation5 + $0x254] sm:$0xf0]  ;;  %v3567_v39 = vld [vmem:[#allocation2 + $0x28] sm:$0xff]  ;;  %v2288_v43 = vor.u32 %v3019_v27, %v2285_v28  ;;  %v2604_v48 = vor.u32 %v3100_v30, %v2603_v29 }
  0x3d   :  { %834 = vmatpush.bf16.msra.mxu2 %v2372_v62  ;;  %v3035_v44 = vld [vmem:[#allocation5 + $0xd4] sm:$0xf]  ;;  %v2349_v46 = vld [vmem:[#allocation5 + $0xd8] sm:$0xf0]  ;;  %v154_v47 = vrot.slane %v3567_v39, 7  ;;  %v137_v53 = vld [vmem:[#allocation8 + $0x20] sm:$0xff]  ;;  %v2540_v57 = vor.u32 %v3084_v38, %v2539_v37  ;;  %v3596_v38 = vpack.c.bf16 %v3527_v35, %v3567_v39 }
  0x3e   :  { %853 = vmatpush.bf16.msra.mxu3 %v2436_v63  ;;  %797 = vmatmul.bf16.vlgmr.msra.gmra.mxu0 %v3548_v4  ;;  %v3017_v49 = vld [vmem:[#allocation5 + $0x44] sm:$0xf]  ;;  %v2277_v50 = vld [vmem:[#allocation5 + $0x48] sm:$0xf0]  ;;  %v2595_v51 = vld [vmem:[#allocation5 + $0x2c0] sm:$0xf]  ;;  %v160_v55 = vsel %vm159_vm0, %v153_v31, %v155_v32  ;;  %v162_v56 = vsel %vm159_vm0, %v151_v26, %v153_v31  ;;  %v2352_v32 = vor.u32 %v3035_v44, %v2349_v46 }
  0x3f   :  { %816 = vmatmul.bf16.vlgmr.msra.gmra.mxu1 %v3550_v9  ;;  %865 = vmatpush.bf16.msrb.mxu0 %v2556_v14  ;;  %v3098_v52 = vld [vmem:[#allocation5 + $0x2c4] sm:$0xf0]  ;;  %v139_v54 = vld [vmem:[#allocation8 + $0x30] sm:$0xff]  ;;  %v140_v60 = vld [vmem:[#allocation8 + $0x38] sm:$0xff]  ;;  %v161_v61 = vsel %vm159_vm0, %v154_v47, %v156_v41  ;;  %v163_v62 = vsel %vm159_vm0, %v152_v40, %v154_v47  ;;  %v2280_v63 = vor.u32 %v3017_v49, %v2277_v50  ;;  %v176_v46 = vrot.slane %v3513_v18, 1  ;;  %s2225_s26 = sshll.u32 %s4038_s9, 4  ;;  %s2226_s26 = int_to_ptr.hbm [resolvable:$true] %s2225_s26 }
  0x40   :  { %884 = vmatpush.bf16.msrb.mxu1 %v2620_v5  ;;  %835 = vmatmul.bf16.vlgmr.msra.gmra.mxu2 %v3554_v10  ;;  %v138_v59 = vld [vmem:[#allocation8 + $0x28] sm:$0xff]  ;;  %v3033_v1 = vld [vmem:[#allocation5 + $0xc4] sm:$0xf]  ;;  %v2596_v2 = vor.u32 %v3098_v52, %v2595_v51  ;;  %v172_v5 = vmul.f32 %v162_v56, %v137_v53  ;;  %v174_v6 = vmul.f32 %v160_v55, %v139_v54  ;;  %v3015_v7 = vld [vmem:[#allocation5 + $0x34] sm:$0xf]  ;;  %v178_v50 = vrot.slane %v3515_v19, 1 }
  0x41   :  { %903 = vmatpush.bf16.msrb.mxu2 %v2304_v0  ;;  %854 = vmatmul.bf16.vlgmr.msra.gmra.mxu3 %v3558_v13  ;;  %v2531_v0 = vld [vmem:[#allocation5 + $0x240] sm:$0xf]  ;;  %v3082_v26 = vld [vmem:[#allocation5 + $0x244] sm:$0xf0]  ;;  %v2341_v3 = vld [vmem:[#allocation5 + $0xc8] sm:$0xf0]  ;;  %v173_v41 = vmul.f32 %v163_v62, %v138_v59  ;;  %v175_v11 = vmul.f32 %v161_v61, %v140_v60  ;;  %v3592_v31 = vpack.c.bf16 %v3518_v22, %v3560_v15 }
  0x42   :  { %922 = vmatpush.bf16.msrb.mxu3 %v2368_v16  ;;  %v2269_v8 = vld [vmem:[#allocation5 + $0x38] sm:$0xf0]  ;;  %v2587_v12 = vld [vmem:[#allocation5 + $0x2b0] sm:$0xf]  ;;  %v3096_v14 = vld [vmem:[#allocation5 + $0x2b4] sm:$0xf0]  ;;  %v2532_v40 = vor.u32 %v3082_v26, %v2531_v0  ;;  %v2344_v16 = vor.u32 %v3033_v1, %v2341_v3 }
  0x43   :  { %866 = vmatpush.bf16.msrb.mxu0 %v2548_v36  ;;  %v2523_v20 = vld [vmem:[#allocation5 + $0x230] sm:$0xf]  ;;  %v3080_v21 = vld [vmem:[#allocation5 + $0x234] sm:$0xf0]  ;;  %v3031_v23 = vld [vmem:[#allocation5 + $0xb4] sm:$0xf]  ;;  %v2588_v25 = vor.u32 %v3096_v14, %v2587_v12  ;;  %v3588_v30 = vpack.c.bf16 %v175_v11, %v173_v41 }
  0x44   :  { %885 = vmatpush.bf16.msrb.mxu1 %v2612_v24  ;;  %v3586_v24 = vpack.c.bf16 %v174_v6, %v172_v5  ;;  %v2333_v27 = vld [vmem:[#allocation5 + $0xb8] sm:$0xf0]  ;;  %v3013_v28 = vld [vmem:[#allocation5 + $0x24] sm:$0xf]  ;;  %v2261_v29 = vld [vmem:[#allocation5 + $0x28] sm:$0xf0] }
  0x45   :  { %904 = vmatpush.bf16.msrb.mxu2 %v2296_v17  ;;  %v2272_v17 = vor.u32 %v3015_v7, %v2269_v8  ;;  %v2579_v36 = vld [vmem:[#allocation5 + $0x2a0] sm:$0xf]  ;;  %v3094_v37 = vld [vmem:[#allocation5 + $0x2a4] sm:$0xf0]  ;;  %v2336_v47 = vor.u32 %v3031_v23, %v2333_v27  ;;  %v3029_v49 = vld [vmem:[#allocation5 + $0xa4] sm:$0xf] }
  0x46   :  { %923 = vmatpush.bf16.msrb.mxu3 %v2360_v42  ;;  %v2524_v42 = vor.u32 %v3080_v21, %v2523_v20  ;;  %v3078_v44 = vld [vmem:[#allocation5 + $0x224] sm:$0xf0]  ;;  %v180_v51 = vrot.slane %v3560_v15, 1  ;;  %v2580_v52 = vor.u32 %v3094_v37, %v2579_v36  ;;  %v2325_v53 = vld [vmem:[#allocation5 + $0xa8] sm:$0xf0]  ;;  %v181_v0 = vrot.slane %v3567_v39, 1 }
  0x47   :  { %867 = vmatpush.bf16.msrb.mxu0 %v2540_v57  ;;  %v3011_v54 = vld [vmem:[#allocation5 + $0x14] sm:$0xf]  ;;  %v2253_v55 = vld [vmem:[#allocation5 + $0x18] sm:$0xf0]  ;;  %v2507_v57 = vld [vmem:[#allocation5 + $0x210] sm:$0xf]  ;;  %v2328_v26 = vor.u32 %v3029_v49, %v2325_v53 }
  0x48   :  { %886 = vmatpush.bf16.msrb.mxu1 %v2604_v48  ;;  %v2264_v48 = vor.u32 %v3013_v28, %v2261_v29  ;;  %v3076_v59 = vld [vmem:[#allocation5 + $0x214] sm:$0xf0]  ;;  %v2571_v60 = vld [vmem:[#allocation5 + $0x290] sm:$0xf]  ;;  %v3027_v19 = vld [vmem:[#allocation5 + $0x94] sm:$0xf]  ;;  %v2256_v1 = vor.u32 %v3011_v54, %v2253_v55 }
  0x49   :  { %905 = vmatpush.bf16.msrb.mxu2 %v2288_v43  ;;  %v2515_v43 = vld [vmem:[#allocation5 + $0x220] sm:$0xf]  ;;  %v3092_v61 = vld [vmem:[#allocation5 + $0x294] sm:$0xf0]  ;;  %v2317_v62 = vld [vmem:[#allocation5 + $0x98] sm:$0xf0] }
  0x4a   :  { %924 = vmatpush.bf16.msrb.mxu3 %v2352_v32  ;;  %v2516_v56 = vor.u32 %v3078_v44, %v2515_v43  ;;  %v177_v32 = vrot.slane %v3523_v33, 1  ;;  %v2245_v3 = vld [vmem:[#allocation5 + $0x8] sm:$0xf0]  ;;  %v2563_v5 = vld [vmem:[#allocation5 + $0x280] sm:$0xf]  ;;  %v2572_v6 = vor.u32 %v3092_v61, %v2571_v60  ;;  %v143_v41 = vld [vmem:[#allocation10 + $0x10] sm:$0xff]  ;;  %v2320_v28 = vor.u32 %v3027_v19, %v2317_v62 }
  0x4b   :  { %868 = vmatpush.bf16.msrb.mxu0 %v2532_v40  ;;  %v3090_v7 = vld [vmem:[#allocation5 + $0x284] sm:$0xf0]  ;;  %v141_v8 = vld [vmem:[#allocation10] sm:$0xff]  ;;  %v3087_v14 = vld [vmem:[#allocation5 + $0x274] sm:$0xf]  ;;  %vm1134_vm7 = vcmask 1040384  }
  0x4c   :  { %887 = vmatpush.bf16.msrb.mxu1 %v2596_v2  ;;  %v3009_v2 = vld [vmem:[#allocation5 + $0x4] sm:$0xf]  ;;  %v2499_v11 = vld [vmem:[#allocation5 + $0x200] sm:$0xf]  ;;  %v142_v12 = vld [vmem:[#allocation10 + $0x8] sm:$0xff]  ;;  %v2564_v43 = vor.u32 %v3090_v7, %v2563_v5 }
  0x4d   :  { %906 = vmatpush.bf16.msrb.mxu2 %v2280_v63  ;;  %v179_v63 = vrot.slane %v3525_v34, 1  ;;  %v189_v34 = vsel %vm184_vm1, %v176_v46, %v178_v50  ;;  %v2557_v40 = vld [vmem:[#allocation5 + $0x278] sm:$0xf0]  ;;  %v2248_v29 = vor.u32 %v3009_v2, %v2245_v3  ;;  %v3074_v36 = vld [vmem:[#allocation5 + $0x204] sm:$0xf0] }
  0x4e   :  { %925 = vmatpush.bf16.msrb.mxu3 %v2344_v16  ;;  %802 = vmatmul.bf16.gmra.mxu0 %v3586_v24  ;;  %v2508_v16 = vor.u32 %v3076_v59, %v2507_v57  ;;  %v144_v20 = vld [vmem:[#allocation10 + $0x18] sm:$0xff]  ;;  %v3025_v37 = vld [vmem:[#allocation5 + $0x84] sm:$0xf]  ;;  %v193_v44 = vmul.f32 %v189_v34, %v141_v8  ;;  %v2549_v59 = vld [vmem:[#allocation5 + $0x268] sm:$0xf0]  ;;  %v2500_v60 = vor.u32 %v3074_v36, %v2499_v11  ;;  %v183_v36 = vrot.slane %v3527_v35, 1 }
  0x4f   :  { %821 = vmatmul.bf16.gmra.mxu1 %v3588_v30  ;;  %869 = vmatpush.bf16.msrb.mxu0 %v2524_v42  ;;  %v188_v21 = vsel %vm184_vm1, %v179_v63, %v181_v0  ;;  %v190_v23 = vsel %vm184_vm1, %v177_v32, %v179_v63  ;;  %v2493_v27 = vld [vmem:[#allocation5 + $0x1f8] sm:$0xf0]  ;;  %v2309_v42 = vld [vmem:[#allocation5 + $0x88] sm:$0xf0]  ;;  %v3085_v57 = vld [vmem:[#allocation5 + $0x264] sm:$0xf] }
  0x50   :  { %888 = vmatpush.bf16.msrb.mxu1 %v2588_v25  ;;  %840 = vmatmul.bf16.gmra.mxu2 %v3592_v31  ;;  %v3071_v25 = vld [vmem:[#allocation5 + $0x1f4] sm:$0xf]  ;;  %v2429_v49 = vld [vmem:[#allocation5 + $0x178] sm:$0xf0]  ;;  %v194_v53 = vmul.f32 %v190_v23, %v142_v12  ;;  %v196_v54 = vmul.f32 %v188_v21, %v144_v20  ;;  %v2312_v61 = vor.u32 %v3025_v37, %v2309_v42  ;;  %v3053_v62 = vld [vmem:[#allocation5 + $0x164] sm:$0xf] }
  0x51   :  { %907 = vmatpush.bf16.msrb.mxu2 %v2272_v17  ;;  %859 = vmatmul.bf16.gmra.mxu3 %v3596_v38  ;;  %v187_v17 = vsel %vm184_vm1, %v178_v50, %v180_v51  ;;  %v3103_v50 = vld [vmem:[#allocation5 + $0x2f4] sm:$0xf]  ;;  %v2496_v55 = vor.u32 %v3071_v25, %v2493_v27  ;;  %v2421_v63 = vld [vmem:[#allocation5 + $0x168] sm:$0xf0]  ;;  %v3069_v2 = vld [vmem:[#allocation5 + $0x1e4] sm:$0xf]  ;;  %v192_v15 = vsel %vm184_vm1, %v183_v36, %v177_v32 }
  0x52   :  { %926 = vmatpush.bf16.msrb.mxu3 %v2336_v47  ;;  %v2560_v47 = vor.u32 %v3087_v14, %v2557_v40  ;;  %v2485_v3 = vld [vmem:[#allocation5 + $0x1e8] sm:$0xf0]  ;;  %v3101_v5 = vld [vmem:[#allocation5 + $0x2e4] sm:$0xf]  ;;  %v3627_v7 = vpack.c.bf16 %v196_v54, %v194_v53  ;;  %v2541_v11 = vld [vmem:[#allocation5 + $0x258] sm:$0xf0]  ;;  %v2424_v34 = vor.u32 %v3053_v62, %v2421_v63 }
  0x53   :  { %870 = vmatpush.bf16.msrb.mxu0 %v2516_v56  ;;  %v2621_v56 = vld [vmem:[#allocation5 + $0x2f8] sm:$0xf0]  ;;  %v2613_v8 = vld [vmem:[#allocation5 + $0x2e8] sm:$0xf0]  ;;  %v2488_v12 = vor.u32 %v3069_v2, %v2485_v3  ;;  %v3051_v14 = vld [vmem:[#allocation5 + $0x154] sm:$0xf] }
  0x54   :  { %889 = vmatpush.bf16.msrb.mxu1 %v2580_v52  ;;  %v195_v52 = vmul.f32 %v187_v17, %v143_v41  ;;  %v3083_v41 = vld [vmem:[#allocation5 + $0x254] sm:$0xf]  ;;  %v2413_v40 = vld [vmem:[#allocation5 + $0x158] sm:$0xf0]  ;;  %v3081_v27 = vld [vmem:[#allocation5 + $0x244] sm:$0xf] }
  0x55   :  { %908 = vmatpush.bf16.msrb.mxu2 %v2264_v48  ;;  %v3055_v48 = vld [vmem:[#allocation5 + $0x174] sm:$0xf]  ;;  %v2544_v17 = vor.u32 %v3083_v41, %v2541_v11  ;;  %v2477_v21 = vld [vmem:[#allocation5 + $0x1d8] sm:$0xf0]  ;;  %v2416_v37 = vor.u32 %v3051_v14, %v2413_v40  ;;  %v2597_v53 = vld [vmem:[#allocation5 + $0x2c8] sm:$0xf0] }
  0x56   :  { %927 = vmatpush.bf16.msrb.mxu3 %v2328_v26  ;;  %v2432_v19 = vor.u32 %v3055_v48, %v2429_v49  ;;  %v2624_v26 = vor.u32 %v3103_v50, %v2621_v56  ;;  %v3067_v20 = vld [vmem:[#allocation5 + $0x1d4] sm:$0xf]  ;;  %v2605_v25 = vld [vmem:[#allocation5 + $0x2d8] sm:$0xf0]  ;;  %v3065_v49 = vld [vmem:[#allocation5 + $0x1c4] sm:$0xf] }
  0x57   :  { %871 = vmatpush.bf16.msrb.mxu0 %v2508_v16  ;;  %v2616_v16 = vor.u32 %v3101_v5, %v2613_v8  ;;  %v3099_v23 = vld [vmem:[#allocation5 + $0x2d4] sm:$0xf]  ;;  %v2480_v42 = vor.u32 %v3067_v20, %v2477_v21  ;;  %v2469_v50 = vld [vmem:[#allocation5 + $0x1c8] sm:$0xf0]  ;;  %v2525_v54 = vld [vmem:[#allocation5 + $0x238] sm:$0xf0] }
  0x58   :  { %890 = vmatpush.bf16.msrb.mxu1 %v2572_v6  ;;  %v3625_v6 = vpack.c.bf16 %v195_v52, %v193_v44  ;;  %v2405_v44 = vld [vmem:[#allocation5 + $0x148] sm:$0xf0]  ;;  %v3097_v52 = vld [vmem:[#allocation5 + $0x2c4] sm:$0xf]  ;;  %v3047_v18 = vld [vmem:[#allocation5 + $0x134] sm:$0xf] }
  0x59   :  { %909 = vmatpush.bf16.msrb.mxu2 %v2256_v1  ;;  %v2552_v1 = vor.u32 %v3085_v57, %v2549_v59  ;;  %v146_v56 = vld [vmem:[#allocation10 + $0x28] sm:$0xff]  ;;  %v148_v57 = vld [vmem:[#allocation10 + $0x38] sm:$0xff]  ;;  %v186_v59 = vsel %vm184_vm1, %v181_v0, %v183_v36  ;;  %v3063_v62 = vld [vmem:[#allocation5 + $0x1b4] sm:$0xf] }
  0x5a   :  { %928 = vmatpush.bf16.msrb.mxu3 %v2320_v28  ;;  %v2533_v28 = vld [vmem:[#allocation5 + $0x248] sm:$0xf0]  ;;  %v2461_v39 = vld [vmem:[#allocation5 + $0x1b8] sm:$0xf0]  ;;  %v3095_v63 = vld [vmem:[#allocation5 + $0x2b4] sm:$0xf]  ;;  %v200_v33 = vmul.f32 %v192_v15, %v148_v57 }
  0x5b   :  { %872 = vmatpush.bf16.msrb.mxu0 %v2500_v60  ;;  %v2536_v48 = vor.u32 %v3081_v27, %v2533_v28  ;;  %v2472_v60 = vor.u32 %v3065_v49, %v2469_v50  ;;  %v2589_v2 = vld [vmem:[#allocation5 + $0x2b8] sm:$0xf0]  ;;  %v3077_v3 = vld [vmem:[#allocation5 + $0x224] sm:$0xf]  ;;  %v2517_v32 = vld [vmem:[#allocation5 + $0x228] sm:$0xf0]  ;;  %v2464_v8 = vor.u32 %v3063_v62, %v2461_v39 }
  0x5c   :  { %891 = vmatpush.bf16.msrb.mxu1 %v2564_v43  ;;  %v3049_v43 = vld [vmem:[#allocation5 + $0x144] sm:$0xf]  ;;  %v2389_v11 = vld [vmem:[#allocation5 + $0x128] sm:$0xf0]  ;;  %v2381_v36 = vld [vmem:[#allocation5 + $0x118] sm:$0xf0] }
  0x5d   :  { %910 = vmatpush.bf16.msrb.mxu2 %v2248_v29  ;;  %v182_v29 = vrot.slane %v3518_v22, 1  ;;  %v147_v22 = vld [vmem:[#allocation10 + $0x30] sm:$0xff]  ;;  %v3045_v41 = vld [vmem:[#allocation5 + $0x124] sm:$0xf]  ;;  %v2453_v40 = vld [vmem:[#allocation5 + $0x1a8] sm:$0xf0] }
  0x5e   :  { %929 = vmatpush.bf16.msrb.mxu3 %v2312_v61  ;;  %873 = vmatmul.bf16.vlgmr.msrb.gmra.mxu0 %v3625_v6  ;;  %v2397_v61 = vld [vmem:[#allocation5 + $0x138] sm:$0xf0]  ;;  %v3061_v14 = vld [vmem:[#allocation5 + $0x1a4] sm:$0xf]  ;;  %v2581_v21 = vld [vmem:[#allocation5 + $0x2a8] sm:$0xf0]  ;;  %v2392_v27 = vor.u32 %v3045_v41, %v2389_v11 }
  0x5f   :  { %941 = vmatpush.bf16.msra.mxu0 %v2432_v19  ;;  %892 = vmatmul.bf16.vlgmr.msrb.gmra.mxu1 %v3627_v7  ;;  %v185_v35 = vsel %vm184_vm1, %v180_v51, %v182_v29  ;;  %v2408_v51 = vor.u32 %v3049_v43, %v2405_v44  ;;  %v2400_v5 = vor.u32 %v3047_v18, %v2397_v61  ;;  %v3059_v43 = vld [vmem:[#allocation5 + $0x194] sm:$0xf]  ;;  %v2445_v44 = vld [vmem:[#allocation5 + $0x198] sm:$0xf0]  ;;  %v3073_v49 = vld [vmem:[#allocation5 + $0x204] sm:$0xf] }
  0x60   :  { %960 = vmatpush.bf16.msra.mxu1 %v2496_v55  ;;  %911 = vmatmul.bf16.vlgmr.msrb.gmra.mxu2 %v3548_v4  ;;  %v145_v4 = vld [vmem:[#allocation10 + $0x20] sm:$0xff]  ;;  %v191_v55 = vsel %vm184_vm1, %v182_v29, %v176_v46  ;;  %v2600_v46 = vor.u32 %v3097_v52, %v2597_v53  ;;  %v2456_v28 = vor.u32 %v3061_v14, %v2453_v40  ;;  %v3043_v29 = vld [vmem:[#allocation5 + $0x114] sm:$0xf]  ;;  %v2501_v50 = vld [vmem:[#allocation5 + $0x208] sm:$0xf0] }
  0x61   :  { %979 = vmatpush.bf16.msra.mxu2 %v2560_v47  ;;  %930 = vmatmul.bf16.vlgmr.msrb.gmra.mxu3 %v3550_v9  ;;  %v2608_v47 = vor.u32 %v3099_v23, %v2605_v25  ;;  %v3079_v9 = vld [vmem:[#allocation5 + $0x234] sm:$0xf]  ;;  %v199_v0 = vmul.f32 %v191_v55, %v147_v22  ;;  %v2509_v25 = vld [vmem:[#allocation5 + $0x218] sm:$0xf0]  ;;  %v2384_v52 = vor.u32 %v3043_v29, %v2381_v36  ;;  %v3041_v53 = vld [vmem:[#allocation5 + $0x104] sm:$0xf] }
  0x62   :  { %998 = vmatpush.bf16.msra.mxu3 %v2624_v26  ;;  %v2528_v19 = vor.u32 %v3079_v9, %v2525_v54  ;;  %v197_v26 = vmul.f32 %v185_v35, %v145_v4  ;;  %v3075_v23 = vld [vmem:[#allocation5 + $0x214] sm:$0xf]  ;;  %v2448_v4 = vor.u32 %v3059_v43, %v2445_v44  ;;  %v2504_v54 = vor.u32 %v3073_v49, %v2501_v50  ;;  %v2373_v22 = vld [vmem:[#allocation5 + $0x108] sm:$0xf0]  ;;  %v3057_v35 = vld [vmem:[#allocation5 + $0x184] sm:$0xf] }
  0x63   :  { %942 = vmatpush.bf16.msra.mxu0 %v2424_v34  ;;  %v2592_v34 = vor.u32 %v3095_v63, %v2589_v2  ;;  %v2437_v55 = vld [vmem:[#allocation5 + $0x188] sm:$0xf0] }
  0x64   :  { %961 = vmatpush.bf16.msra.mxu1 %v2488_v12  ;;  %v2520_v12 = vor.u32 %v3077_v3, %v2517_v32  ;;  %v2565_v57 = vld [vmem:[#allocation5 + $0x288] sm:$0xf0] }
  0x65   :  { %980 = vmatpush.bf16.msra.mxu2 %v2552_v1  ;;  %v198_v1 = vmul.f32 %v186_v59, %v146_v56  ;;  %v3089_v56 = vld [vmem:[#allocation5 + $0x284] sm:$0xf]  ;;  %v2376_v59 = vor.u32 %v3041_v53, %v2373_v22 }
  0x66   :  { %999 = vmatpush.bf16.msra.mxu3 %v2616_v16  ;;  %v3093_v16 = vld [vmem:[#allocation5 + $0x2a4] sm:$0xf] }
  0x67   :  { %943 = vmatpush.bf16.msra.mxu0 %v2416_v37  ;;  %v212_v20 = vpack.c.bf16 %v200_v33, %v198_v1  ;;  %v2584_v37 = vor.u32 %v3093_v16, %v2581_v21 }
  0x68   :  { %962 = vmatpush.bf16.msra.mxu1 %v2480_v42  ;;  %v2512_v42 = vor.u32 %v3075_v23, %v2509_v25 }
  0x69   :  { %981 = vmatpush.bf16.msra.mxu2 %v2544_v17  ;;  %v211_v17 = vpack.c.bf16 %v199_v0, %v197_v26 }
  0x6a   :  { %1000 = vmatpush.bf16.msra.mxu3 %v2608_v47  ;;  %v3091_v47 = vld [vmem:[#allocation5 + $0x294] sm:$0xf] }
  0x6b   :  { %944 = vmatpush.bf16.msra.mxu0 %v2408_v51 }
  0x6c   :  { %963 = vmatpush.bf16.msra.mxu1 %v2472_v60 }
  0x6d   :  { %982 = vmatpush.bf16.msra.mxu2 %v2536_v48  ;;  %v2573_v48 = vld [vmem:[#allocation5 + $0x298] sm:$0xf0] }
  0x6e   :  { %1001 = vmatpush.bf16.msra.mxu3 %v2600_v46  ;;  %878 = vmatmul.bf16.gmra.mxu0 %v211_v17  ;;  %v2576_v9 = vor.u32 %v3091_v47, %v2573_v48 }
  0x6f   :  { %945 = vmatpush.bf16.msra.mxu0 %v2400_v5  ;;  %897 = vmatmul.bf16.gmra.mxu1 %v212_v20 }
  0x70   :  { %964 = vmatpush.bf16.msra.mxu1 %v2464_v8  ;;  %916 = vmatmul.bf16.gmra.mxu2 %v3586_v24  ;;  %v2440_v24 = vor.u32 %v3057_v35, %v2437_v55 }
  0x71   :  { %983 = vmatpush.bf16.msra.mxu2 %v2528_v19  ;;  %935 = vmatmul.bf16.gmra.mxu3 %v3588_v30  ;;  %v2568_v30 = vor.u32 %v3089_v56, %v2565_v57 }
  0x72   :  { %1002 = vmatpush.bf16.msra.mxu3 %v2592_v34 }
  0x73   :  { %946 = vmatpush.bf16.msra.mxu0 %v2392_v27 }
  0x74   :  { %965 = vmatpush.bf16.msra.mxu1 %v2456_v28 }
  0x75   :  { %984 = vmatpush.bf16.msra.mxu2 %v2520_v12 }
  0x76   :  { %1003 = vmatpush.bf16.msra.mxu3 %v2584_v37 }
  0x77   :  { %947 = vmatpush.bf16.msra.mxu0 %v2384_v52 }
  0x78   :  { %966 = vmatpush.bf16.msra.mxu1 %v2448_v4 }
  0x79   :  { %985 = vmatpush.bf16.msra.mxu2 %v2512_v42 }
  0x7a   :  { %1004 = vmatpush.bf16.msra.mxu3 %v2576_v9 }
  0x7b   :  { %948 = vmatpush.bf16.msra.mxu0 %v2376_v59 }
  0x7c   :  { %967 = vmatpush.bf16.msra.mxu1 %v2440_v24 }
  0x7d   :  { %986 = vmatpush.bf16.msra.mxu2 %v2504_v54 }
  0x7e   :  { %1005 = vmatpush.bf16.msra.mxu3 %v2568_v30  ;;  %949 = vmatmul.bf16.vlgmr.msra.gmra.mxu0 %v3554_v10 }
  0x7f   :  { %968 = vmatmul.bf16.vlgmr.msra.gmra.mxu1 %v3558_v13 }
  0x80   :  { %987 = vmatmul.bf16.vlgmr.msra.gmra.mxu2 %v3625_v6 }
  0x81   :  { %1006 = vmatmul.bf16.vlgmr.msra.gmra.mxu3 %v3627_v7 }
  0x8e   :  { %954 = vmatmul.bf16.gmra.mxu0 %v3592_v31 }
  0x8f   :  { %973 = vmatmul.bf16.gmra.mxu1 %v3596_v38 }
  0x90   :  { %992 = vmatmul.bf16.gmra.mxu2 %v211_v17 }
  0x91   :  { %1011 = vmatmul.bf16.gmra.mxu3 %v212_v20 }
  0xbb   :  { %v798_v15 = vpop.f32.mrf.mxu0 }
  0xbc   :  { %v817_v51 = vpop.f32.mrf.mxu1 }
  0xbd   :  { %v818_v5 = vadd.f32 %v817_v51, %v798_v15 }
  0xc3   :  { %v836_v60 = vpop.f32.mrf.mxu2  ;;  %v800_v61 = vpop.f32.mrf.mxu0 }
  0xc4   :  { %v855_v18 = vpop.f32.mrf.mxu3  ;;  %v819_v46 = vpop.f32.mrf.mxu1  ;;  %v837_v11 = vadd.f32 %v836_v60, %v818_v5 }
  0xc5   :  { %v820_v1 = vadd.f32 %v819_v46, %v800_v61 }
  0xc6   :  { %v856_v14 = vadd.f32 %v855_v18, %v837_v11 }
  0xcb   :  { %v838_v19 = vpop.f32.mrf.mxu2  ;;  %v803_v62 = vpop.f32.mrf.mxu0 }
  0xcc   :  { %v857_v10 = vpop.f32.mrf.mxu3  ;;  %v822_v13 = vpop.f32.mrf.mxu1  ;;  %v839_v8 = vadd.f32 %v838_v19, %v820_v1 }
  0xcd   :  { %v823_v41 = vadd.f32 %v822_v13, %v803_v62 }
  0xce   :  { %v858_v12 = vadd.f32 %v857_v10, %v839_v8 }
  0xd3   :  { %v841_v39 = vpop.f32.mrf.mxu2  ;;  %v805_v63 = vpop.f32.mrf.mxu0 }
  0xd4   :  { %v860_v6 = vpop.f32.mrf.mxu3  ;;  %v824_v7 = vpop.f32.mrf.mxu1  ;;  %v842_v34 = vadd.f32 %v841_v39, %v823_v41 }
  0xd5   :  { %v825_v25 = vadd.f32 %v824_v7, %v805_v63 }
  0xd6   :  { %v861_v40 = vadd.f32 %v860_v6, %v842_v34 }
  0xdb   :  { %v843_v26 = vpop.f32.mrf.mxu2  ;;  %v874_v0 = vpop.f32.mrf.mxu0 }
  0xdc   :  { %v862_v31 = vpop.f32.mrf.mxu3  ;;  %v893_v38 = vpop.f32.mrf.mxu1  ;;  %v875_v27 = vadd.f32 %v874_v0, %v856_v14  ;;  %v844_v29 = vadd.f32 %v843_v26, %v825_v25 }
  0xde   :  { %v3665_v37 = vadd.f32 %v893_v38, %v875_v27  ;;  %v863_v43 = vadd.f32 %v862_v31, %v844_v29 }
  0xe0   :  { %v1035_v52 = vmul.f32 %v3665_v37, %v3665_v37 }
  0xe3   :  { %v3659_v33 = vpop.f32.mrf.mxu2  ;;  %v876_v3 = vpop.f32.mrf.mxu0 }
  0xe4   :  { %v3661_v2 = vpop.f32.mrf.mxu3  ;;  %v895_v32 = vpop.f32.mrf.mxu1  ;;  %v877_v16 = vadd.f32 %v876_v3, %v858_v12 }
  0xe5   :  { %v932_v5 = vadd.f32 %v3661_v2, %v3659_v33 }
  0xe6   :  { %v3663_v36 = vadd.f32 %v895_v32, %v877_v16 }
  0xe8   :  { %v1037_v44 = vmul.f32 %v3663_v36, %v3663_v36  ;;  %v1017_v4 = vadd.f32 %v3663_v36, %v3665_v37 }
  0xea   :  { %v1043_v54 = vadd.f32 %v1037_v44, %v1035_v52 }
  0xeb   :  { %v914_v17 = vpop.f32.mrf.mxu2  ;;  %v879_v21 = vpop.f32.mrf.mxu0 }
  0xec   :  { %v933_v20 = vpop.f32.mrf.mxu3  ;;  %v898_v23 = vpop.f32.mrf.mxu1  ;;  %v880_v28 = vadd.f32 %v879_v21, %v861_v40 }
  0xed   :  { %v934_v1 = vadd.f32 %v933_v20, %v914_v17 }
  0xee   :  { %v3667_v42 = vadd.f32 %v898_v23, %v880_v28 }
  0xf0   :  { %v1039_v53 = vmul.f32 %v3667_v42, %v3667_v42  ;;  %v1018_v22 = vadd.f32 %v1017_v4, %v3667_v42 }
  0xf2   :  { %v1044_v55 = vadd.f32 %v1043_v54, %v1039_v53 }
  0xf3   :  { %v917_v47 = vpop.f32.mrf.mxu2  ;;  %v881_v49 = vpop.f32.mrf.mxu0 }
  0xf4   :  { %v936_v48 = vpop.f32.mrf.mxu3  ;;  %v900_v50 = vpop.f32.mrf.mxu1  ;;  %v882_v9 = vadd.f32 %v881_v49, %v863_v43 }
  0xf5   :  { %v937_v8 = vadd.f32 %v936_v48, %v917_v47 }
  0xf6   :  { %v3678_v35 = vadd.f32 %v900_v50, %v882_v9 }
  0xf8   :  { %v1019_v56 = vadd.f32 %v1018_v22, %v3678_v35  ;;  %v1041_v57 = vmul.f32 %v3678_v35, %v3678_v35 }
  0xfa   :  { %v1020_v59 = vrot.slane %v1019_v56, 4  ;;  %v1045_v24 = vadd.f32 %v1044_v55, %v1041_v57 }
  0xfb   :  { %v919_v30 = vpop.f32.mrf.mxu2  ;;  %v950_v51 = vpop.f32.mrf.mxu0 }
  0xfc   :  { %v938_v15 = vpop.f32.mrf.mxu3  ;;  %v969_v60 = vpop.f32.mrf.mxu1  ;;  %v1021_v18 = vadd.f32 %v1020_v59, %v1019_v56  ;;  %v1046_v61 = vrot.slane %v1045_v24, 4  ;;  %v951_v34 = vadd.f32 %v950_v51, %v932_v5 }
  0xfd   :  { %v939_v28 = vadd.f32 %v938_v15, %v919_v30 }
  0xfe   :  { %v1022_v46 = vrot.slane %v1021_v18, 2  ;;  %v1047_v19 = vadd.f32 %v1046_v61, %v1045_v24  ;;  %v970_v16 = vadd.f32 %v969_v60, %v951_v34 }
 0x100   :  { %v1023_v10 = vadd.f32 %v1022_v46, %v1021_v18  ;;  %v1048_v62 = vrot.slane %v1047_v19, 2 }
 0x102   :  { %v1024_v6 = vrot.slane %v1023_v10, 1  ;;  %v1049_v63 = vadd.f32 %v1048_v62, %v1047_v19 }
 0x103   :  { %v988_v13 = vpop.f32.mrf.mxu2  ;;  %v952_v7 = vpop.f32.mrf.mxu0 }
 0x104   :  { %v1007_v39 = vpop.f32.mrf.mxu3  ;;  %v971_v26 = vpop.f32.mrf.mxu1  ;;  %v3683_v31 = vadd.f32 %v1024_v6, %v1023_v10  ;;  %v1050_v0 = vrot.slane %v1049_v63, 1  ;;  %v953_v41 = vadd.f32 %v952_v7, %v934_v1  ;;  %v989_v29 = vadd.f32 %v988_v13, %v970_v16 }
 0x106   :  { %1061 = vrot.lane.b32.xlu0 %v3683_v31, %s3425_s24  ;;  %v3687_v38 = vadd.f32 %v1050_v0, %v1049_v63  ;;  %v972_v40 = vadd.f32 %v971_v26, %v953_v41  ;;  %v3695_v33 = vadd.f32 %v1007_v39, %v989_v29  ;;  %v3716_v26 = vand.u32 127, %v157_v45 }
 0x108   :  { %1072 = vrot.lane.b32.xlu1 %v3687_v38, %s3425_s24  ;;  %v1036_v52 = vmul.f32 %v3695_v33, %v3695_v33  ;;  %vm1067_vm2 = vcmp.lt.s32.totalorder %v3716_v26, 16  ;;  %vm1084_vm3 = vcmp.lt.s32.totalorder %v3716_v26, 32  ;;  %vm1101_vm4 = vcmp.lt.s32.totalorder %v3716_v26, 64 }
 0x10b   :  { %v990_v3 = vpop.f32.mrf.mxu2  ;;  %v955_v11 = vpop.f32.mrf.mxu0 }
 0x10c   :  { %v1009_v32 = vpop.f32.mrf.mxu3  ;;  %v956_v12 = vadd.f32 %v955_v11, %v937_v8  ;;  %v974_v14 = vpop.f32.mrf.mxu1  ;;  %v991_v21 = vadd.f32 %v990_v3, %v972_v40 }
 0x10e   :  { %v975_v23 = vadd.f32 %v974_v14, %v956_v12  ;;  %v3693_v43 = vadd.f32 %v1009_v32, %v991_v21 }
 0x110   :  { %v1038_v48 = vmul.f32 %v3693_v43, %v3693_v43  ;;  %v1026_v4 = vadd.f32 %v3693_v43, %v3695_v33 }
 0x112   :  { %v1052_v22 = vadd.f32 %v1038_v48, %v1036_v52 }
 0x113   :  { %v993_v25 = vpop.f32.mrf.mxu2  ;;  %v957_v20 = vpop.f32.mrf.mxu0 }
 0x114   :  { %v1012_v27 = vpop.f32.mrf.mxu3  ;;  %v994_v17 = vadd.f32 %v993_v25, %v975_v23  ;;  %v958_v44 = vadd.f32 %v957_v20, %v939_v28  ;;  %v976_v47 = vpop.f32.mrf.mxu1  ;;  %v3152_v20 = vld [vmem:[#allocation7 + $0x174] sm:$0xf0] }
 0x116   :  { %v3697_v2 = vadd.f32 %v1012_v27, %v994_v17  ;;  %v977_v49 = vadd.f32 %v976_v47, %v958_v44  ;;  %v2811_v17 = vld [vmem:[#allocation7 + $0x170] sm:$0xf] }
 0x117   :  { %v2875_v44 = vld [vmem:[#allocation7 + $0x1f0] sm:$0xf]  ;;  %v2812_v48 = vor.u32 %v3152_v20, %v2811_v17 }
 0x118   :  { %v1040_v53 = vmul.f32 %v3697_v2, %v3697_v2  ;;  %v1027_v55 = vadd.f32 %v1026_v4, %v3697_v2 }
 0x119   :  { %1855 = vmatpush.bf16.msrb.mxu2 %v2812_v48  ;;  %v2779_v48 = vld [vmem:[#allocation7 + $0x130] sm:$0xf] }
 0x11a   :  { %v1053_v57 = vadd.f32 %v1052_v22, %v1040_v53  ;;  %v2867_v22 = vld [vmem:[#allocation7 + $0x1e0] sm:$0xf] }
 0x11b   :  { %v995_v50 = vpop.f32.mrf.mxu2 }
 0x11c   :  { %v996_v9 = vadd.f32 %v995_v50, %v977_v49  ;;  %v1014_v54 = vpop.f32.mrf.mxu3  ;;  %v3168_v49 = vld [vmem:[#allocation7 + $0x1f4] sm:$0xf0] }
 0x11d   :  { %v2876_v50 = vor.u32 %v3168_v49, %v2875_v44  ;;  %v3144_v49 = vld [vmem:[#allocation7 + $0x134] sm:$0xf0] }
 0x11e   :  { %v3708_v56 = vadd.f32 %v1014_v54, %v996_v9  ;;  %v2803_v9 = vld [vmem:[#allocation7 + $0x160] sm:$0xf]  ;;  %v3150_v54 = vld [vmem:[#allocation7 + $0x164] sm:$0xf0] }
 0x11f   :  { %1874 = vmatpush.bf16.msrb.mxu3 %v2876_v50  ;;  %v2843_v50 = vld [vmem:[#allocation7 + $0x1b0] sm:$0xf] }
 0x120   :  { %v1028_v59 = vadd.f32 %v1027_v55, %v3708_v56  ;;  %v1042_v24 = vmul.f32 %v3708_v56, %v3708_v56  ;;  %v2683_v55 = vld [vmem:[#allocation7 + $0x70] sm:$0xf] }
 0x122   :  { %v1029_v30 = vrot.slane %v1028_v59, 4  ;;  %v1054_v15 = vadd.f32 %v1053_v57, %v1042_v24  ;;  %v3120_v57 = vld [vmem:[#allocation7 + $0x74] sm:$0xf0]  ;;  %v3166_v24 = vld [vmem:[#allocation7 + $0x1e4] sm:$0xf0] }
 0x124   :  { %v1030_v51 = vadd.f32 %v1029_v30, %v1028_v59  ;;  %v1055_v60 = vrot.slane %v1054_v15, 4  ;;  %v2804_v59 = vor.u32 %v3150_v54, %v2803_v9  ;;  %v2684_v30 = vor.u32 %v3120_v57, %v2683_v55  ;;  %v3160_v9 = vld [vmem:[#allocation7 + $0x1b4] sm:$0xf0]  ;;  %v2723_v57 = vld [vmem:[#allocation7 + $0xc0] sm:$0xf] }
 0x125   :  { %v2844_v55 = vor.u32 %v3160_v9, %v2843_v50  ;;  %v3119_v50 = vld [vmem:[#allocation7 + $0x74] sm:$0xf]  ;;  %v3106_v9 = vld [vmem:[#allocation7 + $0x4] sm:$0xf0] }
 0x126   :  { %v1031_v18 = vrot.slane %v1030_v51, 2  ;;  %v1056_v61 = vadd.f32 %v1055_v60, %v1054_v15  ;;  %v2868_v15 = vor.u32 %v3166_v24, %v2867_v22  ;;  %v3136_v60 = vld [vmem:[#allocation7 + $0xf4] sm:$0xf0]  ;;  %1856 = vmatpush.bf16.msrb.mxu2 %v2804_v59  ;;  %1817 = vmatpush.bf16.msrb.mxu0 %v2684_v30  ;;  %v3130_v59 = vld [vmem:[#allocation7 + $0xc4] sm:$0xf0] }
 0x127   :  { %v2651_v24 = vld [vmem:[#allocation7 + $0x30] sm:$0xf]  ;;  %v3112_v30 = vld [vmem:[#allocation7 + $0x34] sm:$0xf0] }
 0x128   :  { %v1032_v46 = vadd.f32 %v1031_v18, %v1030_v51  ;;  %v1057_v19 = vrot.slane %v1056_v61, 2  ;;  %v2747_v51 = vld [vmem:[#allocation7 + $0xf0] sm:$0xf]  ;;  %1875 = vmatpush.bf16.msrb.mxu3 %v2868_v15  ;;  %v3142_v15 = vld [vmem:[#allocation7 + $0x124] sm:$0xf0] }
 0x12a   :  { %v1033_v10 = vrot.slane %v1032_v46, 1  ;;  %v1058_v62 = vadd.f32 %v1057_v19, %v1056_v61  ;;  %v2795_v19 = vld [vmem:[#allocation7 + $0x150] sm:$0xf] }
 0x12c   :  { %v1034_v13 = vadd.f32 %v1033_v10, %v1032_v46  ;;  %v1059_v39 = vrot.slane %v1058_v62, 1  ;;  %v2748_v46 = vor.u32 %v3136_v60, %v2747_v51  ;;  %v3148_v10 = vld [vmem:[#allocation7 + $0x154] sm:$0xf0] }
 0x12e   :  { %1063 = vrot.lane.b32.xlu0 %v1034_v13, %s3425_s24  ;;  %v1060_v6 = vadd.f32 %v1059_v39, %v1058_v62  ;;  %v2859_v62 = vld [vmem:[#allocation7 + $0x1d0] sm:$0xf]  ;;  %1836 = vmatpush.bf16.msrb.mxu1 %v2748_v46  ;;  %v3118_v39 = vld [vmem:[#allocation7 + $0x64] sm:$0xf0]  ;;  %v2835_v46 = vld [vmem:[#allocation7 + $0x1a0] sm:$0xf] }
 0x130   :  { %1074 = vrot.lane.b32.xlu1 %v1060_v6, %s3425_s24 }
 0x178   :  { %v1062_v63 = vpop.permute.xlu0 %1061 }
 0x17a   :  { %v1073_v7 = vpop.permute.xlu1 %1072 }
 0x1a0   :  { %v1064_v0 = vpop.permute.xlu0 %1063 }
 0x1a1   :  { %v1069_v1 = vsel %vm1067_vm2, %v1064_v0, %v1062_v63  ;;  %v1068_v45 = vsel %vm1067_vm2, %v1062_v63, %v1064_v0  ;;  %v3164_v63 = vld [vmem:[#allocation7 + $0x1d4] sm:$0xf0] }
 0x1a2   :  { %v1075_v3 = vpop.permute.xlu1 %1074  ;;  %v1070_v32 = vadd.f32 %v1069_v1, %v3683_v31  ;;  %v1071_v31 = vadd.f32 %v1068_v45, %v1034_v13  ;;  %v2675_v13 = vld [vmem:[#allocation7 + $0x60] sm:$0xf]  ;;  %v2860_v0 = vor.u32 %v3164_v63, %v2859_v62  ;;  %v2667_v45 = vld [vmem:[#allocation7 + $0x50] sm:$0xf] }
 0x1a3   :  { %v1076_v5 = vsel %vm1067_vm2, %v1073_v7, %v1075_v3  ;;  %v1077_v8 = vsel %vm1067_vm2, %v1075_v3, %v1073_v7  ;;  %v2676_v7 = vor.u32 %v3118_v39, %v2675_v13  ;;  %v2739_v1 = vld [vmem:[#allocation7 + $0xe0] sm:$0xf]  ;;  %v3134_v3 = vld [vmem:[#allocation7 + $0xe4] sm:$0xf0]  ;;  %v2715_v62 = vld [vmem:[#allocation7 + $0xb0] sm:$0xf] }
 0x1a4   :  { %v1078_v41 = vadd.f32 %v1077_v8, %v3687_v38  ;;  %v1079_v11 = vadd.f32 %v1076_v5, %v1060_v6  ;;  %1080 = vrot.lane.b32.xlu2 %v1070_v32, %s3430_s4  ;;  %v2796_v6 = vor.u32 %v3148_v10, %v2795_v19  ;;  %v2740_v5 = vor.u32 %v3134_v3, %v2739_v1  ;;  %v2787_v8 = vld [vmem:[#allocation7 + $0x140] sm:$0xf]  ;;  %v3158_v19 = vld [vmem:[#allocation7 + $0x1a4] sm:$0xf0]  ;;  %v3128_v13 = vld [vmem:[#allocation7 + $0xb4] sm:$0xf0] }
 0x1a5   :  { %1818 = vmatpush.bf16.msrb.mxu0 %v2676_v7  ;;  %1876 = vmatpush.bf16.msrb.mxu3 %v2860_v0  ;;  %v2836_v10 = vor.u32 %v3158_v19, %v2835_v46  ;;  %v2643_v39 = vld [vmem:[#allocation7 + $0x20] sm:$0xf]  ;;  %v2716_v63 = vor.u32 %v3128_v13, %v2715_v62  ;;  %v3110_v7 = vld [vmem:[#allocation7 + $0x24] sm:$0xf0]  ;;  %v2763_v0 = vld [vmem:[#allocation7 + $0x110] sm:$0xf] }
 0x1a6   :  { %1091 = vrot.lane.b32.xlu1 %v1079_v11, %s3430_s4  ;;  %1089 = vrot.lane.b32.xlu0 %v1078_v41, %s3430_s4  ;;  %v3140_v1 = vld [vmem:[#allocation7 + $0x114] sm:$0xf0]  ;;  %v3133_v46 = vld [vmem:[#allocation7 + $0xe4] sm:$0xf]  ;;  %v2741_v13 = vld [vmem:[#allocation7 + $0xe8] sm:$0xf0] }
 0x1a7   :  { %1857 = vmatpush.bf16.msrb.mxu2 %v2796_v6  ;;  %1837 = vmatpush.bf16.msrb.mxu1 %v2740_v5  ;;  %v2764_v3 = vor.u32 %v3140_v1, %v2763_v0  ;;  %v3156_v5 = vld [vmem:[#allocation7 + $0x194] sm:$0xf0]  ;;  %v3182_v0 = vld [vmem:[#allocation7 + $0x264] sm:$0xf0] }
 0x1ac   :  { %1082 = vrot.lane.b32.xlu2 %v1071_v31, %s3430_s4 }
 0x1fe   :  { %v1081_v34 = vpop.permute.xlu2 %1080 }
 0x206   :  { %v1083_v12 = vpop.permute.xlu2 %1082 }
 0x207   :  { %v1085_v38 = vsel %vm1084_vm3, %v1081_v34, %v1083_v12  ;;  %v1086_v14 = vsel %vm1084_vm3, %v1083_v12, %v1081_v34  ;;  %v3162_v12 = vld [vmem:[#allocation7 + $0x1c4] sm:$0xf0] }
 0x208   :  { %v1087_v40 = vadd.f32 %v1086_v14, %v1070_v32  ;;  %v1088_v16 = vadd.f32 %v1085_v38, %v1071_v31  ;;  %v3116_v31 = vld [vmem:[#allocation7 + $0x54] sm:$0xf0] }
 0x20a   :  { %1097 = vrot.lane.b32.xlu2 %v1087_v40, %s3431_s8  ;;  %1099 = vrot.lane.b32.xlu0 %v1088_v16, %s3431_s8 }
 0x218   :  { %v1092_v21 = vpop.permute.xlu1 %1091  ;;  %v1090_v23 = vpop.permute.xlu0 %1089 }
 0x219   :  { %v1093_v25 = vsel %vm1084_vm3, %v1090_v23, %v1092_v21  ;;  %v1094_v27 = vsel %vm1084_vm3, %v1092_v21, %v1090_v23  ;;  %v2731_v21 = vld [vmem:[#allocation7 + $0xd0] sm:$0xf]  ;;  %v3132_v23 = vld [vmem:[#allocation7 + $0xd4] sm:$0xf0] }
 0x21a   :  { %v3744_v28 = vadd.f32 %v1094_v27, %v1078_v41  ;;  %v3746_v29 = vadd.f32 %v1093_v25, %v1079_v11  ;;  %v3146_v41 = vld [vmem:[#allocation7 + $0x144] sm:$0xf0]  ;;  %v2851_v11 = vld [vmem:[#allocation7 + $0x1c0] sm:$0xf]  ;;  %v2732_v20 = vor.u32 %v3132_v23, %v2731_v21  ;;  %v2699_v23 = vld [vmem:[#allocation7 + $0x90] sm:$0xf] }
 0x21b   :  { %v2788_v34 = vor.u32 %v3146_v41, %v2787_v8  ;;  %v2707_v8 = vld [vmem:[#allocation7 + $0xa0] sm:$0xf]  ;;  %v3154_v21 = vld [vmem:[#allocation7 + $0x184] sm:$0xf0] }
 0x21c   :  { %1106 = vrot.lane.b32.xlu1 %v3744_v28, %s3431_s8  ;;  %1108 = vrot.lane.b32.xlu2 %v3746_v29, %s3431_s8 }
 0x21d   :  { %1858 = vmatpush.bf16.msrb.mxu2 %v2788_v34  ;;  %1838 = vmatpush.bf16.msrb.mxu1 %v2732_v20  ;;  %v2635_v34 = vld [vmem:[#allocation7 + $0x10] sm:$0xf] }
 0x264   :  { %v1098_v52 = vpop.permute.xlu2 %1097 }
 0x276   :  { %v1109_v38 = vpop.permute.xlu2 %1108 }
 0x27c   :  { %v1100_v47 = vpop.permute.xlu0 %1099 }
 0x27d   :  { %v1102_v4 = vsel %vm1101_vm4, %v1098_v52, %v1100_v47  ;;  %v1103_v53 = vsel %vm1101_vm4, %v1100_v47, %v1098_v52  ;;  %v2659_v52 = vld [vmem:[#allocation7 + $0x40] sm:$0xf] }
 0x27e   :  { %v1104_v18 = vadd.f32 %v1103_v53, %v1087_v40  ;;  %v1105_v61 = vadd.f32 %v1102_v4, %v1088_v16  ;;  %v2668_v40 = vor.u32 %v3116_v31, %v2667_v45  ;;  %v2852_v16 = vor.u32 %v3162_v12, %v2851_v11  ;;  %v3114_v4 = vld [vmem:[#allocation7 + $0x44] sm:$0xf0] }
 0x27f   :  { %v2780_v53 = vor.u32 %v3144_v49, %v2779_v48  ;;  %v2660_v22 = vor.u32 %v3114_v4, %v2659_v52  ;;  %v2644_v11 = vor.u32 %v3110_v7, %v2643_v39  ;;  %v3126_v31 = vld [vmem:[#allocation7 + $0xa4] sm:$0xf0]  ;;  %v2685_v52 = vld [vmem:[#allocation7 + $0x78] sm:$0xf0]  ;;  %v3135_v4 = vld [vmem:[#allocation7 + $0xf4] sm:$0xf] }
 0x280   :  { %v1114_v32 = vadd.f32 %v1105_v61, %v1104_v18  ;;  %1819 = vmatpush.bf16.msrb.mxu0 %v2668_v40  ;;  %1877 = vmatpush.bf16.msrb.mxu3 %v2852_v16  ;;  %v2652_v18 = vor.u32 %v3112_v30, %v2651_v24  ;;  %v2708_v12 = vor.u32 %v3126_v31, %v2707_v8  ;;  %v3138_v40 = vld [vmem:[#allocation7 + $0x104] sm:$0xf0]  ;;  %v2819_v16 = vld [vmem:[#allocation7 + $0x180] sm:$0xf]  ;;  %v3003_v39 = vld [vmem:[#allocation7 + $0x2f0] sm:$0xf] }
 0x281   :  { %1859 = vmatpush.bf16.msrb.mxu2 %v2780_v53  ;;  %v2627_v53 = vld [vmem:[#allocation7] sm:$0xf]  ;;  %v3122_v24 = vld [vmem:[#allocation7 + $0x84] sm:$0xf0]  ;;  %v2669_v8 = vld [vmem:[#allocation7 + $0x58] sm:$0xf0] }
 0x282   :  { %v3757_v25 = vmul.f32 0.001953125, %v1114_v32  ;;  %v2827_v32 = vld [vmem:[#allocation7 + $0x190] sm:$0xf]  ;;  %v2931_v7 = vld [vmem:[#allocation7 + $0x260] sm:$0xf] }
 0x283   :  { %v2828_v45 = vor.u32 %v3156_v5, %v2827_v32  ;;  %v2932_v32 = vor.u32 %v3182_v0, %v2931_v7  ;;  %v3115_v5 = vld [vmem:[#allocation7 + $0x54] sm:$0xf]  ;;  %v2733_v31 = vld [vmem:[#allocation7 + $0xd8] sm:$0xf0]  ;;  %v3176_v7 = vld [vmem:[#allocation7 + $0x234] sm:$0xf0] }
 0x284   :  { %v1118_v60 = vmul.f32 %v3757_v25, %v3757_v25  ;;  %1820 = vmatpush.bf16.msrb.mxu0 %v2660_v22  ;;  %1878 = vmatpush.bf16.msrb.mxu3 %v2844_v55  ;;  %v2628_v55 = vor.u32 %v3106_v9, %v2627_v53  ;;  %v3109_v0 = vld [vmem:[#allocation7 + $0x24] sm:$0xf] }
 0x288   :  { %1821 = vmatpush.bf16.msrb.mxu0 %v2652_v18  ;;  %1879 = vmatpush.bf16.msrb.mxu3 %v2836_v10  ;;  %v3184_v18 = vld [vmem:[#allocation7 + $0x274] sm:$0xf0] }
 0x28c   :  { %1822 = vmatpush.bf16.msrb.mxu0 %v2644_v11  ;;  %1880 = vmatpush.bf16.msrb.mxu3 %v2828_v45  ;;  %v1120_v11 = vld [vmem:[%s4034_s5] sm:$0x3]  ;;  %v2672_v45 = vor.u32 %v3115_v5, %v2669_v8  ;;  %v2645_v5 = vld [vmem:[#allocation7 + $0x28] sm:$0xf0]  ;;  %v3125_v8 = vld [vmem:[#allocation7 + $0xa4] sm:$0xf] }
 0x28e   :  { %v1107_v14 = vpop.permute.xlu1 %1106 }
 0x28f   :  { %v1110_v27 = vsel %vm1101_vm4, %v1107_v14, %v1109_v38  ;;  %v1111_v17 = vsel %vm1101_vm4, %v1109_v38, %v1107_v14  ;;  %v3108_v38 = vld [vmem:[#allocation7 + $0x14] sm:$0xf0]  ;;  %v2755_v14 = vld [vmem:[#allocation7 + $0x100] sm:$0xf] }
 0x290   :  { %v1112_v44 = vadd.f32 %v1111_v17, %v3744_v28  ;;  %v1113_v47 = vadd.f32 %v1110_v27, %v3746_v29  ;;  %v2724_v28 = vor.u32 %v3130_v59, %v2723_v57  ;;  %v2771_v29 = vld [vmem:[#allocation7 + $0x120] sm:$0xf]  ;;  %v2756_v27 = vor.u32 %v3138_v40, %v2755_v14  ;;  %v3124_v17 = vld [vmem:[#allocation7 + $0x94] sm:$0xf0]  ;;  %v2749_v57 = vld [vmem:[#allocation7 + $0xf8] sm:$0xf0] }
 0x291   :  { %v2772_v61 = vor.u32 %v3142_v15, %v2771_v29  ;;  %v2636_v20 = vor.u32 %v3108_v38, %v2635_v34  ;;  %v2691_v59 = vld [vmem:[#allocation7 + $0x80] sm:$0xf]  ;;  %v3117_v15 = vld [vmem:[#allocation7 + $0x64] sm:$0xf] }
 0x292   :  { %v1115_v54 = vadd.f32 %v1113_v47, %v1112_v44  ;;  %1839 = vmatpush.bf16.msrb.mxu1 %v2724_v28  ;;  %v2820_v44 = vor.u32 %v3154_v21, %v2819_v16  ;;  %v2700_v47 = vor.u32 %v3124_v17, %v2699_v23  ;;  %v2752_v28 = vor.u32 %v3135_v4, %v2749_v57  ;;  %v2995_v34 = vld [vmem:[#allocation7 + $0x2e0] sm:$0xf]  ;;  %v2923_v16 = vld [vmem:[#allocation7 + $0x250] sm:$0xf]  ;;  %v3180_v21 = vld [vmem:[#allocation7 + $0x254] sm:$0xf0] }
 0x293   :  { %1860 = vmatpush.bf16.msrb.mxu2 %v2772_v61  ;;  %1823 = vmatpush.bf16.msrb.mxu0 %v2636_v20  ;;  %v2692_v30 = vor.u32 %v3122_v24, %v2691_v59  ;;  %v3113_v23 = vld [vmem:[#allocation7 + $0x44] sm:$0xf]  ;;  %v2661_v17 = vld [vmem:[#allocation7 + $0x48] sm:$0xf0]  ;;  %v3178_v57 = vld [vmem:[#allocation7 + $0x244] sm:$0xf0] }
 0x294   :  { %v1117_v51 = vmul.f32 0.001953125, %v1115_v54  ;;  %1881 = vmatpush.bf16.msrb.mxu3 %v2820_v44  ;;  %v2688_v54 = vor.u32 %v3119_v50, %v2685_v52  ;;  %v3129_v20 = vld [vmem:[#allocation7 + $0xc4] sm:$0xf]  ;;  %v2924_v44 = vor.u32 %v3180_v21, %v2923_v16  ;;  %v2987_v50 = vld [vmem:[#allocation7 + $0x2d0] sm:$0xf] }
 0x295   :  { %v3196_v52 = vld [vmem:[#allocation7 + $0x2d4] sm:$0xf0]  ;;  %v3111_v59 = vld [vmem:[#allocation7 + $0x34] sm:$0xf] }
 0x296   :  { %v1119_v6 = vsub.f32 %v1117_v51, %v1118_v60  ;;  %1840 = vmatpush.bf16.msrb.mxu1 %v2716_v63  ;;  %v2677_v51 = vld [vmem:[#allocation7 + $0x68] sm:$0xf0]  ;;  %v2939_v60 = vld [vmem:[#allocation7 + $0x270] sm:$0xf]  ;;  %v3200_v63 = vld [vmem:[#allocation7 + $0x2f4] sm:$0xf0]  ;;  %v2988_v9 = vor.u32 %v3196_v52, %v2987_v50 }
 0x297   :  { %1861 = vmatpush.bf16.msrb.mxu2 %v2764_v3  ;;  %1824 = vmatpush.bf16.msrb.mxu0 %v2628_v55  ;;  %v2680_v61 = vor.u32 %v3117_v15, %v2677_v51  ;;  %v2940_v62 = vor.u32 %v3184_v18, %v2939_v60  ;;  %v3004_v3 = vor.u32 %v3200_v63, %v3003_v39  ;;  %v2915_v55 = vld [vmem:[#allocation7 + $0x240] sm:$0xf]  ;;  %v3194_v51 = vld [vmem:[#allocation7 + $0x2c4] sm:$0xf0]  ;;  %v2907_v63 = vld [vmem:[#allocation7 + $0x230] sm:$0xf] }
 0x298   :  { %v1121_v41 = vadd.f32 1e-05, %v1119_v6  ;;  %1950 = vmatpush.bf16.msra.mxu3 %v2752_v28  ;;  %v2744_v6 = vor.u32 %v3133_v46, %v2741_v13  ;;  %v2653_v28 = vld [vmem:[#allocation7 + $0x38] sm:$0xf0]  ;;  %v2979_v15 = vld [vmem:[#allocation7 + $0x2c0] sm:$0xf]  ;;  %v2916_v46 = vor.u32 %v3178_v57, %v2915_v55 }
 0x299   :  { %v1138_v60 = vld [vmem:[%s4035_s6] sm:$0x3] }
 0x29a   :  { %3214 = vrsqrt.f32 %v1121_v41  ;;  %1841 = vmatpush.bf16.msrb.mxu1 %v2708_v12  ;;  %vm1128_vm6 = vweird.f32 %v1121_v41  ;;  %v3198_v12 = vld [vmem:[#allocation7 + $0x2e4] sm:$0xf0] }
 0x29b   :  { %1862 = vmatpush.bf16.msrb.mxu2 %v2756_v27  ;;  %1893 = vmatpush.bf16.msra.mxu0 %v2940_v62  ;;  %v2996_v40 = vor.u32 %v3198_v12, %v2995_v34  ;;  %v2980_v62 = vor.u32 %v3194_v51, %v2979_v15  ;;  %v2971_v34 = vld [vmem:[#allocation7 + $0x2b0] sm:$0xf]  ;;  %v3192_v12 = vld [vmem:[#allocation7 + $0x2b4] sm:$0xf0] }
 0x29c   :  { %1951 = vmatpush.bf16.msra.mxu3 %v2744_v6  ;;  %v3218_v51 = vld [vmem:[#allocation8 + $0x10] sm:$0xff] }
 0x29e   :  { %1842 = vmatpush.bf16.msrb.mxu1 %v2700_v47  ;;  %v2664_v47 = vor.u32 %v3113_v23, %v2661_v17 }
 0x29f   :  { %1931 = vmatpush.bf16.msra.mxu2 %v2688_v54  ;;  %1894 = vmatpush.bf16.msra.mxu0 %v2932_v32  ;;  %v2908_v32 = vor.u32 %v3176_v7, %v2907_v63  ;;  %v3221_v63 = vld [vmem:[#allocation8 + $0x18] sm:$0xff] }
 0x2a0   :  { %v3215_v48 = vpop.eup %3214 }
 0x2a1   :  { %v1123_v49 = vmul.f32 %v3215_v48, %v1121_v41  ;;  %vm1129_vm5 = vweird.f32 %v3215_v48  ;;  %v3131_v41 = vld [vmem:[#allocation7 + $0xd4] sm:$0xf] }
 0x2a2   :  { %1843 = vmatpush.bf16.msrb.mxu1 %v2692_v30  ;;  %vm3768_vm8 = vmor %vm1128_vm6, %vm1129_vm5  ;;  %v2736_v14 = vor.u32 %v3131_v41, %v2733_v31  ;;  %v3127_v30 = vld [vmem:[#allocation7 + $0xb4] sm:$0xf]  ;;  %v2709_v41 = vld [vmem:[#allocation7 + $0xa8] sm:$0xf0]  ;;  %v2648_v31 = vor.u32 %v3109_v0, %v2645_v5 }
 0x2a3   :  { %v1124_v22 = vmul.f32 %v3215_v48, %v1123_v49  ;;  %1932 = vmatpush.bf16.msra.mxu2 %v2680_v61  ;;  %v2725_v49 = vld [vmem:[#allocation7 + $0xc8] sm:$0xf0]  ;;  %1895 = vmatpush.bf16.msra.mxu0 %v2924_v44  ;;  %v3105_v5 = vld [vmem:[#allocation7 + $0x4] sm:$0xf] }
 0x2a4   :  { %1952 = vmatpush.bf16.msra.mxu3 %v2736_v14 }
 0x2a5   :  { %v1125_v29 = vmul.f32 0.5, %v1124_v22 }
 0x2a6   :  { %1912 = vmatpush.bf16.msra.mxu1 %v3004_v3 }
 0x2a7   :  { %v1126_v19 = vsub.f32 1.5, %v1125_v29  ;;  %1933 = vmatpush.bf16.msra.mxu2 %v2672_v45  ;;  %v2717_v29 = vld [vmem:[#allocation7 + $0xb8] sm:$0xf0]  ;;  %1896 = vmatpush.bf16.msra.mxu0 %v2916_v46 }
 0x2a8   :  { %v2720_v10 = vor.u32 %v3127_v30, %v2717_v29  ;;  %v2637_v30 = vld [vmem:[#allocation7 + $0x18] sm:$0xf0]  ;;  %v3123_v29 = vld [vmem:[#allocation7 + $0x94] sm:$0xf] }
 0x2a9   :  { %v1127_v1 = vmul.f32 %v3215_v48, %v1126_v19  ;;  %v2656_v19 = vor.u32 %v3111_v59, %v2653_v28  ;;  %v3107_v59 = vld [vmem:[#allocation7 + $0x14] sm:$0xf]  ;;  %v2701_v46 = vld [vmem:[#allocation7 + $0x98] sm:$0xf0] }
 0x2aa   :  { %1913 = vmatpush.bf16.msra.mxu1 %v2996_v40 }
 0x2ab   :  { %v1131_v38 = vsel %vm3768_vm8, %v3215_v48, %v1127_v1  ;;  %v2728_v48 = vor.u32 %v3129_v20, %v2725_v49  ;;  %1934 = vmatpush.bf16.msra.mxu2 %v2664_v47  ;;  %1897 = vmatpush.bf16.msra.mxu0 %v2908_v32  ;;  %v2640_v32 = vor.u32 %v3107_v59, %v2637_v30  ;;  %v3186_v30 = vld [vmem:[#allocation7 + $0x284] sm:$0xf0] }
 0x2ac   :  { %v1133_v27 = vrot.slane %v1131_v38, 7 }
 0x2ad   :  { %1953 = vmatpush.bf16.msra.mxu3 %v2728_v48 }
 0x2ae   :  { %v1135_v4 = vsel %vm1134_vm7, %v1131_v38, %v1133_v27  ;;  %1914 = vmatpush.bf16.msra.mxu1 %v2988_v9  ;;  %v3174_v9 = vld [vmem:[#allocation7 + $0x224] sm:$0xf0] }
 0x2af   :  { %v1137_v53 = vmul.f32 %v1135_v4, %v1120_v11  ;;  %1935 = vmatpush.bf16.msra.mxu2 %v2656_v19  ;;  %v2963_v19 = vld [vmem:[#allocation7 + $0x2a0] sm:$0xf] }
 0x2b1   :  { %v1140_v54 = vperm.slane %v1137_v53, 0  ;;  %v1141_v22 = vperm.slane %v1137_v53, 1  ;;  %1954 = vmatpush.bf16.msra.mxu3 %v2720_v10  ;;  %v2899_v53 = vld [vmem:[#allocation7 + $0x220] sm:$0xf]  ;;  %v3190_v10 = vld [vmem:[#allocation7 + $0x2a4] sm:$0xf0] }
 0x2b2   :  { %1915 = vmatpush.bf16.msra.mxu1 %v2980_v62  ;;  %v3219_v62 = vld [vmem:[#allocation8] sm:$0xff] }
 0x2b3   :  { %v1145_v24 = vmul.f32 %v1141_v22, %v3757_v25  ;;  %v1144_v18 = vmul.f32 %v1140_v54, %v3757_v25  ;;  %v1152_v6 = vmul.f32 %v1140_v54, %v3665_v37  ;;  %v1154_v1 = vmul.f32 %v1140_v54, %v3663_v36  ;;  %1936 = vmatpush.bf16.msra.mxu2 %v2648_v31 }
 0x2b4   :  { %v1153_v25 = vmul.f32 %v1141_v22, %v3695_v33  ;;  %v1155_v3 = vmul.f32 %v1141_v22, %v3693_v43  ;;  %v2712_v37 = vor.u32 %v3125_v8, %v2709_v41  ;;  %v1158_v38 = vmul.f32 %v1140_v54, %v3678_v35  ;;  %v2629_v8 = vld [vmem:[#allocation7 + $0x8] sm:$0xf0]  ;;  %v3121_v41 = vld [vmem:[#allocation7 + $0x84] sm:$0xf] }
 0x2b5   :  { %v1148_v61 = vrot.slane %v1145_v24, 7  ;;  %v1159_v14 = vmul.f32 %v1141_v22, %v3708_v56  ;;  %v1156_v36 = vmul.f32 %v1140_v54, %v3667_v42  ;;  %v2972_v33 = vor.u32 %v3192_v12, %v2971_v34  ;;  %v2693_v34 = vld [vmem:[#allocation7 + $0x88] sm:$0xf0]  ;;  %v2955_v12 = vld [vmem:[#allocation7 + $0x290] sm:$0xf] }
 0x2b6   :  { %v1157_v20 = vmul.f32 %v1141_v22, %v3697_v2  ;;  %1955 = vmatpush.bf16.msra.mxu3 %v2712_v37  ;;  %v2704_v31 = vor.u32 %v3123_v29, %v2701_v46  ;;  %v2964_v37 = vor.u32 %v3190_v10, %v2963_v19  ;;  %v3181_v29 = vld [vmem:[#allocation7 + $0x264] sm:$0xf]  ;;  %v2877_v46 = vld [vmem:[#allocation7 + $0x1f8] sm:$0xf0] }
 0x2b7   :  { %v1149_v13 = vsel %vm1134_vm7, %v1144_v18, %v1148_v61  ;;  %1916 = vmatpush.bf16.msra.mxu1 %v2972_v33  ;;  %v3183_v33 = vld [vmem:[#allocation7 + $0x274] sm:$0xf]  ;;  %1937 = vmatpush.bf16.msra.mxu2 %v2640_v32  ;;  %v3222_v32 = vld [vmem:[#allocation8 + $0x20] sm:$0xff] }
 0x2b8   :  { %v1151_v39 = vsub.f32 %v1138_v60, %v1149_v13 }
 0x2ba   :  { %v1161_v11 = vperm.slane %v1151_v39, 0  ;;  %v1162_v45 = vperm.slane %v1151_v39, 1  ;;  %v3220_v39 = vld [vmem:[#allocation8 + $0x8] sm:$0xff]  ;;  %1956 = vmatpush.bf16.msra.mxu3 %v2704_v31 }
 0x2bb   :  { %1917 = vmatpush.bf16.msra.mxu1 %v2964_v37  ;;  %v3224_v37 = vld [vmem:[#allocation8 + $0x28] sm:$0xff] }
 0x2bc   :  { %v1165_v43 = vadd.f32 %v1161_v11, %v1152_v6  ;;  %v1167_v40 = vadd.f32 %v1161_v11, %v1154_v1  ;;  %v1166_v16 = vadd.f32 %v1162_v45, %v1153_v25  ;;  %v1168_v21 = vadd.f32 %v1162_v45, %v1155_v3  ;;  %v2891_v1 = vld [vmem:[#allocation7 + $0x210] sm:$0xf]  ;;  %v3172_v25 = vld [vmem:[#allocation7 + $0x214] sm:$0xf0] }
 0x2bd   :  { %v1171_v23 = vadd.f32 %v1161_v11, %v1158_v38  ;;  %v1172_v27 = vadd.f32 %v1162_v45, %v1159_v14  ;;  %v1169_v17 = vadd.f32 %v1161_v11, %v1156_v36  ;;  %v1170_v50 = vadd.f32 %v1162_v45, %v1157_v20  ;;  %v3188_v38 = vld [vmem:[#allocation7 + $0x294] sm:$0xf0]  ;;  %v2883_v14 = vld [vmem:[#allocation7 + $0x200] sm:$0xf]  ;;  %v3170_v36 = vld [vmem:[#allocation7 + $0x204] sm:$0xf0] }
 0x2be   :  { %v3792_v44 = vmax.f32 %v1165_v43, 0.0  ;;  %v3794_v35 = vmax.f32 %v1167_v40, 0.0  ;;  %v3796_v56 = vmax.f32 %v1166_v16, 0.0  ;;  %v3798_v42 = vmax.f32 %v1168_v21, 0.0  ;;  %v2941_v43 = vld [vmem:[#allocation7 + $0x278] sm:$0xf0] }
 0x2bf   :  { %v3800_v47 = vmax.f32 %v1171_v23, 0.0  ;;  %v3802_v49 = vmax.f32 %v1172_v27, 0.0  ;;  %v3824_v28 = vmax.f32 %v1169_v17, 0.0  ;;  %v3838_v0 = vmax.f32 %v1170_v50, 0.0  ;;  %v3199_v40 = vld [vmem:[#allocation7 + $0x2f4] sm:$0xf] }
 0x2c0   :  { %v3806_v52 = vpack.c.bf16 %v3794_v35, %v3792_v44  ;;  %v3810_v2 = vpack.c.bf16 %v3798_v42, %v3796_v56  ;;  %v1181_v4 = vrot.slane %v3792_v44, 7  ;;  %v1183_v48 = vrot.slane %v3794_v35, 7  ;;  %v3005_v16 = vld [vmem:[#allocation7 + $0x2f8] sm:$0xf0] }
 0x2c1   :  { %v1187_v54 = vrot.slane %v3800_v47, 7  ;;  %v1182_v22 = vrot.slane %v3796_v56, 7  ;;  %v1184_v55 = vrot.slane %v3798_v42, 7  ;;  %v1188_v57 = vrot.slane %v3802_v49, 7 }
 0x2c2   :  { %1863 = vmatmul.bf16.vlgmr.msrb.gmra.mxu2 %v3806_v52  ;;  %1882 = vmatmul.bf16.vlgmr.msrb.gmra.mxu3 %v3810_v2  ;;  %v1193_v24 = vsel %vm159_vm0, %v1181_v4, %v1183_v48  ;;  %v2900_v3 = vor.u32 %v3174_v9, %v2899_v53  ;;  %v2892_v21 = vor.u32 %v3172_v25, %v2891_v1  ;;  %v1185_v27 = vrot.slane %v3824_v28, 7  ;;  %v2813_v53 = vld [vmem:[#allocation7 + $0x178] sm:$0xf0]  ;;  %v3179_v25 = vld [vmem:[#allocation7 + $0x254] sm:$0xf] }
 0x2c3   :  { %v1195_v15 = vsel %vm159_vm0, %v1187_v54, %v1181_v4  ;;  %v1199_v60 = vmul.f32 %v3218_v51, %v1193_v24  ;;  %v1194_v18 = vsel %vm159_vm0, %v1182_v22, %v1184_v55  ;;  %v1196_v61 = vsel %vm159_vm0, %v1188_v57, %v1182_v22  ;;  %v3151_v4 = vld [vmem:[#allocation7 + $0x174] sm:$0xf]  ;;  %v2947_v24 = vld [vmem:[#allocation7 + $0x280] sm:$0xf]  ;;  %v3197_v51 = vld [vmem:[#allocation7 + $0x2e4] sm:$0xf] }
 0x2c4   :  { %v1197_v13 = vmul.f32 %v3219_v62, %v1195_v15  ;;  %v1198_v6 = vmul.f32 %v3220_v39, %v1196_v61  ;;  %v1200_v7 = vmul.f32 %v3221_v63, %v1194_v18  ;;  %1898 = vmatpush.bf16.msra.mxu0 %v2900_v3  ;;  %v2632_v23 = vor.u32 %v3105_v5, %v2629_v8  ;;  %v2933_v15 = vld [vmem:[#allocation7 + $0x268] sm:$0xf0]  ;;  %v3167_v61 = vld [vmem:[#allocation7 + $0x1f4] sm:$0xf]  ;;  %v2925_v3 = vld [vmem:[#allocation7 + $0x258] sm:$0xf0] }
 0x2c5   :  { %v1186_v17 = vrot.slane %v3838_v0, 7  ;;  %v2696_v20 = vor.u32 %v3121_v41, %v2693_v34  ;;  %v2956_v50 = vor.u32 %v3188_v38, %v2955_v12  ;;  %v2884_v9 = vor.u32 %v3170_v36, %v2883_v14  ;;  %v2997_v18 = vld [vmem:[#allocation7 + $0x2e8] sm:$0xf0]  ;;  %v3195_v8 = vld [vmem:[#allocation7 + $0x2d4] sm:$0xf]  ;;  %v3225_v12 = vld [vmem:[#allocation8 + $0x38] sm:$0xff] }
 0x2c6   :  { %v3840_v11 = vpack.c.bf16 %v1199_v60, %v1197_v13  ;;  %v3842_v45 = vpack.c.bf16 %v1200_v7, %v1198_v6  ;;  %v2944_v22 = vor.u32 %v3183_v33, %v2941_v43  ;;  %v3008_v59 = vor.u32 %v3199_v40, %v3005_v16  ;;  %1938 = vmatpush.bf16.msra.mxu2 %v2632_v23  ;;  %v3149_v13 = vld [vmem:[#allocation7 + $0x164] sm:$0xf]  ;;  %v2805_v39 = vld [vmem:[#allocation7 + $0x168] sm:$0xf0]  ;;  %v3223_v41 = vld [vmem:[#allocation8 + $0x30] sm:$0xff] }
 0x2c7   :  { %1957 = vmatpush.bf16.msra.mxu3 %v2696_v20  ;;  %v2816_v60 = vor.u32 %v3151_v4, %v2813_v53  ;;  %v1189_v19 = vsel %vm159_vm0, %v1185_v27, %v1187_v54  ;;  %v1191_v10 = vsel %vm159_vm0, %v1183_v48, %v1185_v27  ;;  %v1190_v62 = vsel %vm159_vm0, %v1186_v17, %v1188_v57  ;;  %v2989_v14 = vld [vmem:[#allocation7 + $0x2d8] sm:$0xf0]  ;;  %v3165_v36 = vld [vmem:[#allocation7 + $0x1e4] sm:$0xf]  ;;  %v2869_v33 = vld [vmem:[#allocation7 + $0x1e8] sm:$0xf0] }
 0x2c8   :  { %1825 = vmatmul.bf16.vlgmr.msrb.gmra.mxu0 %v3840_v11  ;;  %1844 = vmatmul.bf16.vlgmr.msrb.gmra.mxu1 %v3842_v45  ;;  %v1192_v6 = vsel %vm159_vm0, %v1184_v55, %v1186_v17  ;;  %v2948_v54 = vor.u32 %v3186_v30, %v2947_v24  ;;  %v2936_v63 = vor.u32 %v3181_v29, %v2933_v15  ;;  %v3147_v40 = vld [vmem:[#allocation7 + $0x154] sm:$0xf]  ;;  %v2797_v16 = vld [vmem:[#allocation7 + $0x158] sm:$0xf0]  ;;  %v2917_v23 = vld [vmem:[#allocation7 + $0x248] sm:$0xf0] }
 0x2c9   :  { %1899 = vmatpush.bf16.msra.mxu0 %v2892_v21  ;;  %1918 = vmatpush.bf16.msra.mxu1 %v2956_v50  ;;  %v3866_v48 = vpack.c.bf16 %v3800_v47, %v3824_v28  ;;  %v3870_v57 = vpack.c.bf16 %v3802_v49, %v3838_v0  ;;  %v3000_v7 = vor.u32 %v3197_v51, %v2997_v18  ;;  %v3177_v21 = vld [vmem:[#allocation7 + $0x244] sm:$0xf]  ;;  %v2789_v29 = vld [vmem:[#allocation7 + $0x148] sm:$0xf0]  ;;  %v1209_v15 = vrot.slane %v3824_v28, 1 }
 0x2ca   :  { %2007 = vmatpush.bf16.msrb.mxu2 %v2944_v22  ;;  %v2880_v1 = vor.u32 %v3167_v61, %v2877_v46  ;;  %v1201_v5 = vmul.f32 %v3222_v32, %v1191_v10  ;;  %v2808_v55 = vor.u32 %v3149_v13, %v2805_v39  ;;  %v1203_v31 = vmul.f32 %v3223_v41, %v1189_v19  ;;  %v3193_v20 = vld [vmem:[#allocation7 + $0x2c4] sm:$0xf]  ;;  %v3163_v22 = vld [vmem:[#allocation7 + $0x1d4] sm:$0xf]  ;;  %v2973_v13 = vld [vmem:[#allocation7 + $0x2b8] sm:$0xf0] }
 0x2cb   :  { %2026 = vmatpush.bf16.msrb.mxu3 %v3008_v59  ;;  %v1202_v34 = vmul.f32 %v3224_v37, %v1192_v6  ;;  %v1204_v38 = vmul.f32 %v3225_v12, %v1190_v62  ;;  %v2928_v43 = vor.u32 %v3179_v25, %v2925_v3  ;;  %v2992_v27 = vor.u32 %v3195_v8, %v2989_v14  ;;  %v2861_v59 = vld [vmem:[#allocation7 + $0x1d8] sm:$0xf0]  ;;  %v3145_v30 = vld [vmem:[#allocation7 + $0x144] sm:$0xf]  ;;  %v3175_v51 = vld [vmem:[#allocation7 + $0x234] sm:$0xf] }
 0x2cc   :  { %v2872_v17 = vor.u32 %v3165_v36, %v2869_v33  ;;  %v3874_v50 = vpack.c.bf16 %v1203_v31, %v1201_v5  ;;  %v2800_v53 = vor.u32 %v3147_v40, %v2797_v16  ;;  %v2920_v24 = vor.u32 %v3177_v21, %v2917_v23  ;;  %v3191_v10 = vld [vmem:[#allocation7 + $0x2b4] sm:$0xf]  ;;  %v3161_v39 = vld [vmem:[#allocation7 + $0x1c4] sm:$0xf]  ;;  %v2853_v6 = vld [vmem:[#allocation7 + $0x1c8] sm:$0xf0] }
 0x2cd   :  { %1900 = vmatpush.bf16.msra.mxu0 %v2884_v9  ;;  %1919 = vmatpush.bf16.msra.mxu1 %v2948_v54  ;;  %v3876_v4 = vpack.c.bf16 %v1204_v38, %v1202_v34  ;;  %v2981_v9 = vld [vmem:[#allocation7 + $0x2c8] sm:$0xf0]  ;;  %v1205_v18 = vrot.slane %v3792_v44, 1  ;;  %v1207_v61 = vrot.slane %v3794_v35, 1  ;;  %v2864_v19 = vor.u32 %v3163_v22, %v2861_v59  ;;  %v3143_v25 = vld [vmem:[#allocation7 + $0x134] sm:$0xf] }
 0x2ce   :  { %2008 = vmatpush.bf16.msrb.mxu2 %v2936_v63  ;;  %v2984_v46 = vor.u32 %v3193_v20, %v2981_v9  ;;  %v2792_v62 = vor.u32 %v3145_v30, %v2789_v29  ;;  %v1210_v54 = vrot.slane %v3838_v0, 1  ;;  %v1206_v63 = vrot.slane %v3796_v56, 1  ;;  %v2781_v35 = vld [vmem:[#allocation7 + $0x138] sm:$0xf0]  ;;  %v3173_v3 = vld [vmem:[#allocation7 + $0x224] sm:$0xf] }
 0x2cf   :  { %2027 = vmatpush.bf16.msrb.mxu3 %v3000_v7  ;;  %v1208_v7 = vrot.slane %v3798_v42, 1  ;;  %v2901_v32 = vld [vmem:[#allocation7 + $0x228] sm:$0xf0]  ;;  %v2976_v5 = vor.u32 %v3191_v10, %v2973_v13  ;;  %v3189_v8 = vld [vmem:[#allocation7 + $0x2a4] sm:$0xf]  ;;  %v1215_v41 = vsel %vm184_vm1, %v1207_v61, %v1209_v15  ;;  %v1217_v42 = vsel %vm184_vm1, %v1205_v18, %v1207_v61  ;;  %v3231_v44 = vld [vmem:[#allocation10 + $0x30] sm:$0xff] }
 0x2d0   :  { %v2965_v31 = vld [vmem:[#allocation7 + $0x2a8] sm:$0xf0]  ;;  %v3159_v37 = vld [vmem:[#allocation7 + $0x1b4] sm:$0xf]  ;;  %v2845_v34 = vld [vmem:[#allocation7 + $0x1b8] sm:$0xf0]  ;;  %v2784_v14 = vor.u32 %v3143_v25, %v2781_v35  ;;  %v2904_v36 = vor.u32 %v3173_v3, %v2901_v32 }
 0x2d1   :  { %1969 = vmatpush.bf16.msrb.mxu0 %v2816_v60  ;;  %1988 = vmatpush.bf16.msrb.mxu1 %v2880_v1  ;;  %v2909_v60 = vld [vmem:[#allocation7 + $0x238] sm:$0xf0]  ;;  %v1216_v12 = vsel %vm184_vm1, %v1208_v7, %v1210_v54  ;;  %v1218_v38 = vsel %vm184_vm1, %v1206_v63, %v1208_v7  ;;  %v3141_v33 = vld [vmem:[#allocation7 + $0x124] sm:$0xf]  ;;  %v3171_v40 = vld [vmem:[#allocation7 + $0x214] sm:$0xf] }
 0x2d2   :  { %1868 = vmatmul.bf16.gmra.mxu2 %v3866_v48  ;;  %1887 = vmatmul.bf16.gmra.mxu3 %v3870_v57  ;;  %v2912_v1 = vor.u32 %v3175_v51, %v2909_v60  ;;  %v2893_v16 = vld [vmem:[#allocation7 + $0x218] sm:$0xf0]  ;;  %v3226_v21 = vld [vmem:[#allocation10] sm:$0xff]  ;;  %v3187_v20 = vld [vmem:[#allocation7 + $0x294] sm:$0xf] }
 0x2d3   :  { %2009 = vmatpush.bf16.msrb.mxu2 %v2928_v43  ;;  %2028 = vmatpush.bf16.msrb.mxu3 %v2992_v27  ;;  %v2773_v43 = vld [vmem:[#allocation7 + $0x128] sm:$0xf0]  ;;  %v1221_v23 = vmul.f32 %v3226_v21, %v1217_v42  ;;  %v2968_v27 = vor.u32 %v3189_v8, %v2965_v31  ;;  %v2957_v29 = vld [vmem:[#allocation7 + $0x298] sm:$0xf0]  ;;  %v3157_v51 = vld [vmem:[#allocation7 + $0x1a4] sm:$0xf] }
 0x2d4   :  { %v3228_v22 = vld [vmem:[#allocation10 + $0x8] sm:$0xff]  ;;  %v2776_v61 = vor.u32 %v3141_v33, %v2773_v43  ;;  %v2765_v10 = vld [vmem:[#allocation7 + $0x118] sm:$0xf0]  ;;  %v3155_v25 = vld [vmem:[#allocation7 + $0x194] sm:$0xf]  ;;  %v1211_v42 = vrot.slane %v3800_v47, 1 }
 0x2d5   :  { %1970 = vmatpush.bf16.msrb.mxu0 %v2808_v55  ;;  %1989 = vmatpush.bf16.msrb.mxu1 %v2872_v17  ;;  %v2856_v55 = vor.u32 %v3161_v39, %v2853_v6  ;;  %v2848_v17 = vor.u32 %v3159_v37, %v2845_v34  ;;  %v1222_v59 = vmul.f32 %v3228_v22, %v1218_v38  ;;  %v2837_v60 = vld [vmem:[#allocation7 + $0x1a8] sm:$0xf0]  ;;  %v3185_v39 = vld [vmem:[#allocation7 + $0x284] sm:$0xf]  ;;  %v2829_v35 = vld [vmem:[#allocation7 + $0x198] sm:$0xf0] }
 0x2d6   :  { %v2885_v13 = vld [vmem:[#allocation7 + $0x208] sm:$0xf0]  ;;  %v3153_v31 = vld [vmem:[#allocation7 + $0x184] sm:$0xf]  ;;  %v1212_v34 = vrot.slane %v3802_v49, 1  ;;  %v1219_v47 = vsel %vm184_vm1, %v1211_v42, %v1205_v18  ;;  %v3233_v43 = vld [vmem:[#allocation10 + $0x38] sm:$0xff] }
 0x2d7   :  { %2010 = vmatpush.bf16.msrb.mxu2 %v2920_v24  ;;  %2029 = vmatpush.bf16.msrb.mxu3 %v2984_v46  ;;  %v3229_v24 = vld [vmem:[#allocation10 + $0x18] sm:$0xff]  ;;  %v2896_v46 = vor.u32 %v3171_v40, %v2893_v16  ;;  %v2821_v37 = vld [vmem:[#allocation7 + $0x188] sm:$0xf0]  ;;  %v3230_v28 = vld [vmem:[#allocation10 + $0x20] sm:$0xff] }
 0x2d8   :  { %1830 = vmatmul.bf16.gmra.mxu0 %v3874_v50  ;;  %1849 = vmatmul.bf16.gmra.mxu1 %v3876_v4  ;;  %v1224_v30 = vmul.f32 %v3229_v24, %v1216_v12  ;;  %v2824_v38 = vor.u32 %v3153_v31, %v2821_v37  ;;  %v1214_v49 = vsel %vm184_vm1, %v1210_v54, %v1212_v34  ;;  %v3232_v18 = vld [vmem:[#allocation10 + $0x28] sm:$0xff] }
 0x2d9   :  { %1971 = vmatpush.bf16.msrb.mxu0 %v2800_v53  ;;  %1990 = vmatpush.bf16.msrb.mxu1 %v2864_v19  ;;  %v3227_v53 = vld [vmem:[#allocation10 + $0x10] sm:$0xff]  ;;  %v1226_v0 = vmul.f32 %v3232_v18, %v1214_v49 }
 0x2da   :  { %v1223_v9 = vmul.f32 %v3227_v53, %v1215_v41  ;;  %v3139_v19 = vld [vmem:[#allocation7 + $0x114] sm:$0xf]  ;;  %v1234_v7 = vpack.c.bf16 %v1224_v30, %v1222_v59  ;;  %v2832_v41 = vor.u32 %v3155_v25, %v2829_v35 }
 0x2db   :  { %2011 = vmatpush.bf16.msrb.mxu2 %v2912_v1  ;;  %2030 = vmatpush.bf16.msrb.mxu3 %v2976_v5  ;;  %v2949_v1 = vld [vmem:[#allocation7 + $0x288] sm:$0xf0]  ;;  %v2768_v3 = vor.u32 %v3139_v19, %v2765_v10  ;;  %v3137_v5 = vld [vmem:[#allocation7 + $0x104] sm:$0xf] }
 0x2dc   :  { %v1233_v6 = vpack.c.bf16 %v1223_v9, %v1221_v23  ;;  %v2952_v8 = vor.u32 %v3185_v39, %v2949_v1 }
 0x2dd   :  { %1972 = vmatpush.bf16.msrb.mxu0 %v2792_v62  ;;  %1991 = vmatpush.bf16.msrb.mxu1 %v2856_v55  ;;  %v3169_v62 = vld [vmem:[#allocation7 + $0x204] sm:$0xf]  ;;  %v2757_v55 = vld [vmem:[#allocation7 + $0x108] sm:$0xf0] }
 0x2de   :  { %v2888_v32 = vor.u32 %v3169_v62, %v2885_v13  ;;  %v2760_v12 = vor.u32 %v3137_v5, %v2757_v55 }
 0x2df   :  { %2012 = vmatpush.bf16.msrb.mxu2 %v2904_v36  ;;  %2031 = vmatpush.bf16.msrb.mxu3 %v2968_v27  ;;  %v1220_v36 = vsel %vm184_vm1, %v1212_v34, %v1206_v63 }
 0x2e0   :  { %v1228_v40 = vmul.f32 %v3233_v43, %v1220_v36 }
 0x2e1   :  { %1973 = vmatpush.bf16.msrb.mxu0 %v2784_v14  ;;  %1992 = vmatpush.bf16.msrb.mxu1 %v2848_v17  ;;  %v1213_v14 = vsel %vm184_vm1, %v1209_v15, %v1211_v42  ;;  %v1227_v15 = vmul.f32 %v3231_v44, %v1219_v47 }
 0x2e2   :  { %1939 = vmatmul.bf16.vlgmr.msra.gmra.mxu2 %v3840_v11  ;;  %1958 = vmatmul.bf16.vlgmr.msra.gmra.mxu3 %v3842_v45  ;;  %v2960_v11 = vor.u32 %v3187_v20, %v2957_v29  ;;  %v2840_v45 = vor.u32 %v3157_v51, %v2837_v60  ;;  %v1225_v33 = vmul.f32 %v3230_v28, %v1213_v14 }
 0x2e3   :  { %2013 = vmatpush.bf16.msrb.mxu2 %v2896_v46  ;;  %v1240_v16 = vpack.c.bf16 %v1228_v40, %v1226_v0 }
 0x2e4   :  { %2032 = vmatpush.bf16.msrb.mxu3 %v2960_v11  ;;  %v1239_v54 = vpack.c.bf16 %v1227_v15, %v1225_v33 }
 0x2e5   :  { %1974 = vmatpush.bf16.msrb.mxu0 %v2776_v61  ;;  %1993 = vmatpush.bf16.msrb.mxu1 %v2840_v45 }
 0x2e7   :  { %2014 = vmatpush.bf16.msrb.mxu2 %v2888_v32 }
 0x2e8   :  { %1901 = vmatmul.bf16.vlgmr.msra.gmra.mxu0 %v1233_v6  ;;  %1920 = vmatmul.bf16.vlgmr.msra.gmra.mxu1 %v1234_v7 }
 0x2e9   :  { %1975 = vmatpush.bf16.msrb.mxu0 %v2768_v3  ;;  %2033 = vmatpush.bf16.msrb.mxu3 %v2952_v8 }
 0x2ea   :  { %1994 = vmatpush.bf16.msrb.mxu1 %v2832_v41 }
 0x2ed   :  { %1976 = vmatpush.bf16.msrb.mxu0 %v2760_v12 }
 0x2ee   :  { %1995 = vmatpush.bf16.msrb.mxu1 %v2824_v38 }
 0x2f2   :  { %1944 = vmatmul.bf16.gmra.mxu2 %v3874_v50  ;;  %1963 = vmatmul.bf16.gmra.mxu3 %v3876_v4 }
 0x2f8   :  { %1906 = vmatmul.bf16.gmra.mxu0 %v1239_v54  ;;  %1925 = vmatmul.bf16.gmra.mxu1 %v1240_v16 }
 0x302   :  { %2015 = vmatmul.bf16.vlgmr.msrb.gmra.mxu2 %v1233_v6  ;;  %2034 = vmatmul.bf16.vlgmr.msrb.gmra.mxu3 %v1234_v7 }
 0x308   :  { %1977 = vmatmul.bf16.vlgmr.msrb.gmra.mxu0 %v3806_v52  ;;  %1996 = vmatmul.bf16.vlgmr.msrb.gmra.mxu1 %v3810_v2 }
 0x312   :  { %2020 = vmatmul.bf16.gmra.mxu2 %v1239_v54  ;;  %2039 = vmatmul.bf16.gmra.mxu3 %v1240_v16 }
 0x318   :  { %1982 = vmatmul.bf16.gmra.mxu0 %v3866_v48  ;;  %2001 = vmatmul.bf16.gmra.mxu1 %v3870_v57 }
 0x345   :  { %v1826_v58 = vpop.f32.mrf.mxu0  ;;  %v1845_v56 = vpop.f32.mrf.mxu1 }
 0x346   :  { %v1864_v50 = vpop.f32.mrf.mxu2  ;;  %v1883_v4 = vpop.f32.mrf.mxu3  ;;  %v1846_v51 = vadd.f32 %v1845_v56, %v1826_v58 }
 0x348   :  { %v1865_v13 = vadd.f32 %v1864_v50, %v1846_v51 }
 0x34a   :  { %v1884_v39 = vadd.f32 %v1883_v4, %v1865_v13 }
 0x34d   :  { %v1828_v63 = vpop.f32.mrf.mxu0  ;;  %v1847_v21 = vpop.f32.mrf.mxu1 }
 0x34e   :  { %v1866_v23 = vpop.f32.mrf.mxu2  ;;  %v1885_v27 = vpop.f32.mrf.mxu3  ;;  %v1848_v29 = vadd.f32 %v1847_v21, %v1828_v63 }
 0x350   :  { %v1867_v19 = vadd.f32 %v1866_v23, %v1848_v29 }
 0x352   :  { %v1886_v45 = vadd.f32 %v1885_v27, %v1867_v19 }
 0x355   :  { %v1831_v17 = vpop.f32.mrf.mxu0  ;;  %v1850_v20 = vpop.f32.mrf.mxu1 }
 0x356   :  { %v1869_v53 = vpop.f32.mrf.mxu2  ;;  %v1888_v52 = vpop.f32.mrf.mxu3  ;;  %v1851_v60 = vadd.f32 %v1850_v20, %v1831_v17 }
 0x358   :  { %v1870_v11 = vadd.f32 %v1869_v53, %v1851_v60 }
 0x35a   :  { %v1889_v6 = vadd.f32 %v1888_v52, %v1870_v11 }
 0x35d   :  { %v1833_v9 = vpop.f32.mrf.mxu0  ;;  %v1852_v2 = vpop.f32.mrf.mxu1 }
 0x35e   :  { %v1871_v22 = vpop.f32.mrf.mxu2  ;;  %v1890_v59 = vpop.f32.mrf.mxu3  ;;  %v1853_v7 = vadd.f32 %v1852_v2, %v1833_v9 }
 0x360   :  { %v1872_v8 = vadd.f32 %v1871_v22, %v1853_v7 }
 0x362   :  { %v1891_v37 = vadd.f32 %v1890_v59, %v1872_v8 }
 0x365   :  { %v1902_v24 = vpop.f32.mrf.mxu0  ;;  %v1921_v48 = vpop.f32.mrf.mxu1 }
 0x366   :  { %v3928_v30 = vpop.f32.mrf.mxu2  ;;  %v3930_v57 = vpop.f32.mrf.mxu3  ;;  %v1903_v3 = vadd.f32 %v1902_v24, %v1884_v39 }
 0x367   :  { %v1960_v51 = vadd.f32 %v3930_v57, %v3928_v30 }
 0x368   :  { %v3934_v42 = vadd.f32 %v1921_v48, %v1903_v3 }
 0x36a   :  { %v2063_v14 = vmul.f32 %v3934_v42, %v3934_v42 }
 0x36d   :  { %v1904_v61 = vpop.f32.mrf.mxu0  ;;  %v1923_v46 = vpop.f32.mrf.mxu1 }
 0x36e   :  { %v1942_v10 = vpop.f32.mrf.mxu2  ;;  %v1961_v62 = vpop.f32.mrf.mxu3  ;;  %v1905_v1 = vadd.f32 %v1904_v61, %v1886_v45 }
 0x36f   :  { %v1962_v22 = vadd.f32 %v1961_v62, %v1942_v10 }
 0x370   :  { %v3932_v41 = vadd.f32 %v1923_v46, %v1905_v1 }
 0x372   :  { %v2065_v34 = vmul.f32 %v3932_v41, %v3932_v41  ;;  %v2045_v47 = vadd.f32 %v3932_v41, %v3934_v42 }
 0x374   :  { %v2071_v44 = vadd.f32 %v2065_v34, %v2063_v14 }
 0x375   :  { %v1907_v25 = vpop.f32.mrf.mxu0  ;;  %v1926_v35 = vpop.f32.mrf.mxu1 }
 0x376   :  { %v1908_v32 = vadd.f32 %v1907_v25, %v1889_v6  ;;  %v1945_v5 = vpop.f32.mrf.mxu2  ;;  %v1964_v55 = vpop.f32.mrf.mxu3 }
 0x377   :  { %v1965_v19 = vadd.f32 %v1964_v55, %v1945_v5 }
 0x378   :  { %v3936_v31 = vadd.f32 %v1926_v35, %v1908_v32 }
 0x37a   :  { %v2067_v49 = vmul.f32 %v3936_v31, %v3936_v31  ;;  %v2046_v15 = vadd.f32 %v2045_v47, %v3936_v31 }
 0x37c   :  { %v2072_v0 = vadd.f32 %v2071_v44, %v2067_v49 }
 0x37d   :  { %v1909_v12 = vpop.f32.mrf.mxu0  ;;  %v1928_v38 = vpop.f32.mrf.mxu1 }
 0x37e   :  { %v1910_v36 = vadd.f32 %v1909_v12, %v1891_v37  ;;  %v1947_v28 = vpop.f32.mrf.mxu2  ;;  %v1966_v33 = vpop.f32.mrf.mxu3 }
 0x37f   :  { %v1967_v30 = vadd.f32 %v1966_v33, %v1947_v28 }
 0x380   :  { %v3947_v18 = vadd.f32 %v1928_v38, %v1910_v36 }
 0x382   :  { %v2047_v43 = vadd.f32 %v2046_v15, %v3947_v18  ;;  %v2069_v40 = vmul.f32 %v3947_v18, %v3947_v18 }
 0x384   :  { %v2048_v54 = vrot.slane %v2047_v43, 4  ;;  %v2073_v16 = vadd.f32 %v2072_v0, %v2069_v40 }
 0x385   :  { %v1978_v58 = vpop.f32.mrf.mxu0  ;;  %v1997_v56 = vpop.f32.mrf.mxu1 }
 0x386   :  { %v2016_v50 = vpop.f32.mrf.mxu2  ;;  %v2035_v4 = vpop.f32.mrf.mxu3  ;;  %v2049_v63 = vadd.f32 %v2048_v54, %v2047_v43  ;;  %v2074_v21 = vrot.slane %v2073_v16, 4  ;;  %v1979_v46 = vadd.f32 %v1978_v58, %v1960_v51 }
 0x388   :  { %v2050_v23 = vrot.slane %v2049_v63, 2  ;;  %v2075_v27 = vadd.f32 %v2074_v21, %v2073_v16  ;;  %v1998_v39 = vadd.f32 %v1997_v56, %v1979_v46 }
 0x38a   :  { %v2051_v17 = vadd.f32 %v2050_v23, %v2049_v63  ;;  %v2076_v20 = vrot.slane %v2075_v27, 2  ;;  %v2017_v25 = vadd.f32 %v2016_v50, %v1998_v39 }
 0x38c   :  { %v2052_v53 = vrot.slane %v2051_v17, 1  ;;  %v2077_v52 = vadd.f32 %v2076_v20, %v2075_v27  ;;  %v3958_v32 = vadd.f32 %v2035_v4, %v2017_v25 }
 0x38d   :  { %v1980_v9 = vpop.f32.mrf.mxu0  ;;  %v1999_v2 = vpop.f32.mrf.mxu1 }
 0x38e   :  { %v2018_v59 = vpop.f32.mrf.mxu2  ;;  %v2053_v24 = vadd.f32 %v2052_v53, %v2051_v17  ;;  %v2078_v48 = vrot.slane %v2077_v52, 1  ;;  %v2037_v29 = vpop.f32.mrf.mxu3  ;;  %v1981_v60 = vadd.f32 %v1980_v9, %v1962_v22  ;;  %v2064_v38 = vmul.f32 %v3958_v32, %v3958_v32 }
 0x390   :  { %2089 = vrot.lane.b32.xlu0 %v2053_v24, %s3425_s24  ;;  %v2079_v61 = vadd.f32 %v2078_v48, %v2077_v52  ;;  %v2000_v13 = vadd.f32 %v1999_v2, %v1981_v60 }
 0x392   :  { %2097 = vrot.lane.b32.xlu2 %v2079_v61, %s3425_s24  ;;  %v2019_v6 = vadd.f32 %v2018_v59, %v2000_v13 }
 0x394   :  { %v3956_v57 = vadd.f32 %v2037_v29, %v2019_v6 }
 0x395   :  { %v1983_v11 = vpop.f32.mrf.mxu0  ;;  %v2002_v45 = vpop.f32.mrf.mxu1 }
 0x396   :  { %v1984_v10 = vadd.f32 %v1983_v11, %v1965_v19  ;;  %v2021_v62 = vpop.f32.mrf.mxu2  ;;  %v2040_v1 = vpop.f32.mrf.mxu3  ;;  %v2066_v37 = vmul.f32 %v3956_v57, %v3956_v57  ;;  %v2054_v14 = vadd.f32 %v3956_v57, %v3958_v32 }
 0x398   :  { %v2003_v7 = vadd.f32 %v2002_v45, %v1984_v10  ;;  %v2080_v28 = vadd.f32 %v2066_v37, %v2064_v38 }
 0x39a   :  { %v2022_v35 = vadd.f32 %v2021_v62, %v2003_v7 }
 0x39c   :  { %v3960_v8 = vadd.f32 %v2040_v1, %v2022_v35 }
 0x39d   :  { %v1985_v3 = vpop.f32.mrf.mxu0  ;;  %v2004_v55 = vpop.f32.mrf.mxu1 }
 0x39e   :  { %v1986_v5 = vadd.f32 %v1985_v3, %v1967_v30  ;;  %v2023_v12 = vpop.f32.mrf.mxu2  ;;  %v2068_v47 = vmul.f32 %v3960_v8, %v3960_v8  ;;  %v2042_v36 = vpop.f32.mrf.mxu3  ;;  %v2055_v33 = vadd.f32 %v2054_v14, %v3960_v8 }
 0x3a0   :  { %v2005_v34 = vadd.f32 %v2004_v55, %v1986_v5  ;;  %v2081_v15 = vadd.f32 %v2080_v28, %v2068_v47 }
 0x3a2   :  { %v2024_v49 = vadd.f32 %v2023_v12, %v2005_v34 }
 0x3a4   :  { %v3971_v44 = vadd.f32 %v2042_v36, %v2024_v49 }
 0x3a6   :  { %v2056_v0 = vadd.f32 %v2055_v33, %v3971_v44  ;;  %v2070_v43 = vmul.f32 %v3971_v44, %v3971_v44 }
 0x3a8   :  { %v2057_v40 = vrot.slane %v2056_v0, 4  ;;  %v2082_v54 = vadd.f32 %v2081_v15, %v2070_v43 }
 0x3aa   :  { %v2058_v16 = vadd.f32 %v2057_v40, %v2056_v0  ;;  %v2083_v58 = vrot.slane %v2082_v54, 4 }
 0x3ac   :  { %v2059_v56 = vrot.slane %v2058_v16, 2  ;;  %v2084_v50 = vadd.f32 %v2083_v58, %v2082_v54 }
 0x3ae   :  { %v2060_v4 = vadd.f32 %v2059_v56, %v2058_v16  ;;  %v2085_v63 = vrot.slane %v2084_v50, 2 }
 0x3b0   :  { %v2061_v21 = vrot.slane %v2060_v4, 1  ;;  %v2086_v23 = vadd.f32 %v2085_v63, %v2084_v50  ;;  %v2143_v63 = vld [vmem:[%s4036_s7] sm:$0x3]  ;;  %s3432_s7 = smov [#allocation13]  }
 0x3b1   :  { %s2223_s22 = sshll.u32 %s3432_s7, 4  ;;  %s2224_s22 = int_to_ptr.vmem [resolvable:$true] %s2223_s22 }
 0x3b2   :  { %v2062_v27 = vadd.f32 %v2061_v21, %v2060_v4  ;;  %v2087_v17 = vrot.slane %v2086_v23, 1 }
 0x3b4   :  { %2091 = vrot.lane.b32.xlu1 %v2062_v27, %s3425_s24  ;;  %v2088_v20 = vadd.f32 %v2087_v17, %v2086_v23 }
 0x3b6   :  { %2099 = vrot.lane.b32.xlu0 %v2088_v20, %s3425_s24 }
 0x3ec   :  { %v2098_v22 = vpop.permute.xlu2 %2097 }
 0x402   :  { %v2090_v53 = vpop.permute.xlu0 %2089 }
 0x426   :  { %v2092_v52 = vpop.permute.xlu1 %2091 }
 0x427   :  { %v2093_v9 = vsel %vm1067_vm2, %v2090_v53, %v2092_v52  ;;  %v2094_v2 = vsel %vm1067_vm2, %v2092_v52, %v2090_v53  ;;  %v2160_v52 = vld [vmem:[#allocation11] sm:$0x3] }
 0x428   :  { %v2095_v59 = vadd.f32 %v2094_v2, %v2053_v24  ;;  %v2096_v48 = vadd.f32 %v2093_v9, %v2062_v27  ;;  %v2100_v29 = vpop.permute.xlu0 %2099 }
 0x429   :  { %v2102_v51 = vsel %vm1067_vm2, %v2100_v29, %v2098_v22  ;;  %v2101_v46 = vsel %vm1067_vm2, %v2098_v22, %v2100_v29 }
 0x42a   :  { %v2103_v60 = vadd.f32 %v2102_v51, %v2079_v61  ;;  %2105 = vrot.lane.b32.xlu1 %v2095_v59, %s3430_s4  ;;  %2107 = vrot.lane.b32.xlu2 %v2096_v48, %s3430_s4  ;;  %v2104_v19 = vadd.f32 %v2101_v46, %v2088_v20 }
 0x42c   :  { %2113 = vrot.lane.b32.xlu0 %v2103_v60, %s3430_s4 }
 0x432   :  { %2115 = vrot.lane.b32.xlu1 %v2104_v19, %s3430_s4 }
 0x484   :  { %v2108_v13 = vpop.permute.xlu2 %2107 }
 0x49c   :  { %v2106_v24 = vpop.permute.xlu1 %2105 }
 0x49d   :  { %v2109_v11 = vsel %vm1084_vm3, %v2106_v24, %v2108_v13  ;;  %v2110_v61 = vsel %vm1084_vm3, %v2108_v13, %v2106_v24 }
 0x49e   :  { %v2111_v45 = vadd.f32 %v2110_v61, %v2095_v59  ;;  %v2112_v39 = vadd.f32 %v2109_v11, %v2096_v48  ;;  %v2114_v10 = vpop.permute.xlu0 %2113 }
 0x4a0   :  { %2121 = vrot.lane.b32.xlu2 %v2111_v45, %s3431_s8  ;;  %2123 = vrot.lane.b32.xlu0 %v2112_v39, %s3431_s8 }
 0x4a4   :  { %v2116_v62 = vpop.permute.xlu1 %2115 }
 0x4a5   :  { %v2117_v6 = vsel %vm1084_vm3, %v2114_v10, %v2116_v62  ;;  %v2118_v7 = vsel %vm1084_vm3, %v2116_v62, %v2114_v10 }
 0x4a6   :  { %v2119_v1 = vadd.f32 %v2118_v7, %v2103_v60  ;;  %v2120_v25 = vadd.f32 %v2117_v6, %v2104_v19  ;;  %v3234_v7 = vld [vmem:[#allocation2] sm:$0xff] }
 0x4a8   :  { %2129 = vrot.lane.b32.xlu1 %v2119_v1, %s3431_s8  ;;  %2131 = vrot.lane.b32.xlu2 %v2120_v25, %s3431_s8 }
 0x4fa   :  { %v2122_v35 = vpop.permute.xlu2 %2121 }
 0x502   :  { %v2132_v12 = vpop.permute.xlu2 %2131 }
 0x512   :  { %v2124_v30 = vpop.permute.xlu0 %2123 }
 0x513   :  { %v2125_v3 = vsel %vm1101_vm4, %v2122_v35, %v2124_v30  ;;  %v2126_v5 = vsel %vm1101_vm4, %v2124_v30, %v2122_v35  ;;  %v3236_v35 = vld [vmem:[#allocation2 + $0x10] sm:$0xff]  ;;  %v3237_v30 = vld [vmem:[#allocation2 + $0x18] sm:$0xff] }
 0x514   :  { %v2127_v55 = vadd.f32 %v2126_v5, %v2111_v45  ;;  %v2128_v37 = vadd.f32 %v2125_v3, %v2112_v39  ;;  %v3238_v3 = vld [vmem:[#allocation2 + $0x20] sm:$0xff]  ;;  %v3239_v5 = vld [vmem:[#allocation2 + $0x28] sm:$0xff] }
 0x516   :  { %v2137_v34 = vadd.f32 %v2128_v37, %v2127_v55  ;;  %v3240_v55 = vld [vmem:[#allocation2 + $0x30] sm:$0xff] }
 0x518   :  { %v2139_v49 = vmul.f32 0.001953125, %v2137_v34 }
 0x51a   :  { %v2130_v38 = vpop.permute.xlu1 %2129  ;;  %v2141_v15 = vmul.f32 %v2139_v49, %v2139_v49 }
 0x51b   :  { %v2133_v14 = vsel %vm1101_vm4, %v2130_v38, %v2132_v12  ;;  %v2134_v47 = vsel %vm1101_vm4, %v2132_v12, %v2130_v38 }
 0x51c   :  { %v2135_v36 = vadd.f32 %v2134_v47, %v2119_v1  ;;  %v2136_v28 = vadd.f32 %v2133_v14, %v2120_v25  ;;  %v3235_v1 = vld [vmem:[#allocation2 + $0x8] sm:$0xff]  ;;  %v3241_v14 = vld [vmem:[#allocation2 + $0x38] sm:$0xff] }
 0x51e   :  { %v2138_v33 = vadd.f32 %v2136_v28, %v2135_v36 }
 0x520   :  { %v2140_v0 = vmul.f32 0.001953125, %v2138_v33 }
 0x522   :  { %v2142_v43 = vsub.f32 %v2140_v0, %v2141_v15 }
 0x524   :  { %v2144_v40 = vadd.f32 1e-05, %v2142_v43 }
 0x526   :  { %3216 = vrsqrt.f32 %v2144_v40  ;;  %vm2151_vm10 = vweird.f32 %v2144_v40 }
 0x52c   :  { %v3217_v54 = vpop.eup %3216 }
 0x52d   :  { %v2146_v16 = vmul.f32 %v3217_v54, %v2144_v40  ;;  %vm2152_vm9 = vweird.f32 %v3217_v54 }
 0x52e   :  { %vm2153_vm11 = vmor %vm2151_vm10, %vm2152_vm9 }
 0x52f   :  { %v2147_v58 = vmul.f32 %v3217_v54, %v2146_v16 }
 0x531   :  { %v2148_v56 = vmul.f32 0.5, %v2147_v58 }
 0x533   :  { %v2149_v50 = vsub.f32 1.5, %v2148_v56 }
 0x535   :  { %v2150_v4 = vmul.f32 %v3217_v54, %v2149_v50 }
 0x537   :  { %v2154_v26 = vsel %vm2153_vm11, %v3217_v54, %v2150_v4 }
 0x538   :  { %v2156_v21 = vrot.slane %v2154_v26, 7 }
 0x53a   :  { %v2157_v23 = vsel %vm1134_vm7, %v2154_v26, %v2156_v21 }
 0x53b   :  { %v2159_v27 = vmul.f32 %v2157_v23, %v2143_v63 }
 0x53d   :  { %v2162_v17 = vperm.slane %v2159_v27, 0  ;;  %v2163_v20 = vperm.slane %v2159_v27, 1 }
 0x53f   :  { %v2167_v53 = vmul.f32 %v2163_v20, %v2139_v49  ;;  %v2166_v9 = vmul.f32 %v2162_v17, %v2139_v49  ;;  %v2174_v48 = vmul.f32 %v2162_v17, %v3934_v42  ;;  %v2175_v29 = vmul.f32 %v2163_v20, %v3958_v32 }
 0x540   :  { %v2176_v51 = vmul.f32 %v2162_v17, %v3932_v41  ;;  %v2177_v60 = vmul.f32 %v2163_v20, %v3956_v57  ;;  %v2178_v13 = vmul.f32 %v2162_v17, %v3936_v31  ;;  %v2179_v24 = vmul.f32 %v2163_v20, %v3960_v8 }
 0x541   :  { %v2170_v2 = vrot.slane %v2167_v53, 7  ;;  %v2180_v11 = vmul.f32 %v2162_v17, %v3947_v18  ;;  %v2181_v61 = vmul.f32 %v2163_v20, %v3971_v44 }
 0x543   :  { %v2171_v22 = vsel %vm1134_vm7, %v2166_v9, %v2170_v2 }
 0x544   :  { %v2173_v59 = vsub.f32 %v2160_v52, %v2171_v22 }
 0x546   :  { %v2183_v46 = vperm.slane %v2173_v59, 0  ;;  %v2184_v19 = vperm.slane %v2173_v59, 1 }
 0x548   :  { %v2187_v45 = vadd.f32 %v2183_v46, %v2174_v48  ;;  %v2188_v39 = vadd.f32 %v2184_v19, %v2175_v29  ;;  %v2189_v10 = vadd.f32 %v2183_v46, %v2176_v51  ;;  %v2190_v42 = vadd.f32 %v2184_v19, %v2177_v60 }
 0x549   :  { %v2191_v62 = vadd.f32 %v2183_v46, %v2178_v13  ;;  %v2192_v32 = vadd.f32 %v2184_v19, %v2179_v24  ;;  %v2193_v6 = vadd.f32 %v2183_v46, %v2180_v11  ;;  %v2194_v41 = vadd.f32 %v2184_v19, %v2181_v61 }
 0x54a   :  { %v2195_v57 = vadd.f32 %v3234_v7, %v2187_v45  ;;  %v2196_v25 = vadd.f32 %v3235_v1, %v2188_v39  ;;  %v2197_v31 = vadd.f32 %v3236_v35, %v2189_v10  ;;  %v2198_v8 = vadd.f32 %v3237_v30, %v2190_v42 }
 0x54b   :  { %v2199_v18 = vadd.f32 %v3238_v3, %v2191_v62  ;;  %v2200_v44 = vadd.f32 %v3239_v5, %v2192_v32  ;;  %v2201_v37 = vadd.f32 %v3240_v55, %v2193_v6  ;;  %v2202_v47 = vadd.f32 %v3241_v14, %v2194_v41 }
 0x54c   :  { %v2203_v34 = vmax.f32 %v2195_v57, 0.0  ;;  %v2204_v12 = vmax.f32 %v2196_v25, 0.0  ;;  %v2205_v38 = vmax.f32 %v2197_v31, 0.0  ;;  %v2206_v49 = vmax.f32 %v2198_v8, 0.0 }
 0x54d   :  { %v2207_v36 = vmax.f32 %v2199_v18, 0.0  ;;  %v2208_v28 = vmax.f32 %v2200_v44, 0.0  ;;  %v2209_v33 = vmax.f32 %v2201_v37, 0.0  ;;  %v2210_v15 = vmax.f32 %v2202_v47, 0.0 }
 0x54e   :  { %2211 = vst [vmem:[#allocation13] sm:$0xff] %v2203_v34 }
 0x54f   :  { %2212 = vst [vmem:[#allocation13 + $0x8] sm:$0xff] %v2204_v12 }
 0x550   :  { %2213 = vst [vmem:[#allocation13 + $0x10] sm:$0xff] %v2205_v38 }
 0x551   :  { %2214 = vst [vmem:[#allocation13 + $0x18] sm:$0xff] %v2206_v49 }
 0x552   :  { %2215 = vst [vmem:[#allocation13 + $0x20] sm:$0xff] %v2207_v36 }
 0x553   :  { %2216 = vst [vmem:[#allocation13 + $0x28] sm:$0xff] %v2208_v28 }
 0x554   :  { %2217 = vst [vmem:[#allocation13 + $0x30] sm:$0xff] %v2209_v33 }
 0x555   :  { %2218 = vst [vmem:[#allocation13 + $0x38] sm:$0xff] %v2210_v15 }
 0x556   :  { %2231 = dma.vmem_to_hbm [thread:$0]  %s2224_s22, 1024, %s2226_s26, [#allocation4], %s3424_s1, %s3424_s1, %s3425_s24  }
 0x557   :  { %3418 = dma.done.wait [#allocation4], 1024  }
 0x558   :  { %3419 = vsyncadd [#allocation4], 4294966272 }
 0x559   :  { %2236 = vsyncpa [#allocation3], 1 }
 0x55a   :  { %2237 = vsyncpa [#allocation6], 1 }
 0x55b   :  { %2238 = vsyncpa [#allocation9], 1 }
 0x55c   :  { %2239 = vsyncpa [#allocation12], 1 }
 0x55d   :  { %2240 = vsyncpa [#allocation4], 1 }

</bundles_post_ra>
